<compile_context>
chip_gen: v7x
topology: tpu7x:2x2x1
jax: 0.10.0
libtpu: 0.0.40
codegen_flags: <defaults>
</compile_context>

<pallas_src>
import functools

import jax
import jax.numpy as jnp
from jax import lax
from jax import image as jimage
from jax.experimental import pallas as pl
from jax.experimental.pallas import tpu as pltpu


def _round_up(x, m):
    return (x + m - 1) // m * m


def _cdiv(a, b):
    return -(-a // b)


def _full_spec(arr):
    zeros = (0,) * arr.ndim
    return pl.BlockSpec(arr.shape, lambda *_: zeros)


# ----------------------------------------------------------------------------
# SMEM scalar-vector layout for the fused kernel (all f32, one 1-D vector)
# ----------------------------------------------------------------------------
_S_INV_DIM_Y = 0        # 1 / (H - 1)
_S_INV_DIM_X = 1        # 1 / (W - 1)
_S_INV_FX_Q = 2         # 1 / fx_qry
_S_INV_FY_Q = 3         # 1 / fy_qry
_S_CX_Q = 4
_S_CY_Q = 5
_S_FX_R = 6             # fx_ref
_S_FY_R = 7
_S_CX_R = 8
_S_CY_R = 9
_S_T = 10               # forward transform, 16 values row-major
_S_GW = 26              # gaussian weights / M, patch_size**2 values


# ----------------------------------------------------------------------------
# Fused Pallas kernel: positional encoding + ImplicitDepthNet MLP + gaussian
# confidence + depth update/clamp + forward px->m->rigid->px transform.
# Rays live on the LANE axis (channel-first (C, T) blocks).
# ----------------------------------------------------------------------------
def mlp_fused_kernel(num_enc, scal_ref, yxz_ref, noise_ref, rgb_ref, cp_ref,
                     w0_ref, b0_ref, wh_ref, bh_ref, wo_ref, bo_ref,
                     out_ref, enc_ref):
    f32 = jnp.float32
    bf16 = jnp.bfloat16

    y = yxz_ref[0:1, :]
    x = yxz_ref[1:2, :]
    z = yxz_ref[2:3, :]
    tlen = y.shape[1]

    # --- noised / normalised coords for the positional encoding -------------
    enc_ref[0:1, :] = (y + noise_ref[0:1, :]) * scal_ref[_S_INV_DIM_Y]
    enc_ref[1:2, :] = (x + noise_ref[1:2, :]) * scal_ref[_S_INV_DIM_X]
    enc_ref[2:3, :] = z
    pts = enc_ref[0:3, :]

    # --- positional encoding: one sin/cos pass, then double-angle recurrence
    s = jnp.sin(pts)
    c = jnp.cos(pts)
    for i in range(num_enc):
        enc_ref[3 + 6 * i:6 + 6 * i, :] = s
        enc_ref[6 + 6 * i:9 + 6 * i, :] = c
        if i + 1 < num_enc:
            s, c = 2.0 * s * c, 1.0 - 2.0 * s * s
    base = 3 + 6 * num_enc                       # 39 for num_enc=6
    enc_ref[base:base + 3, :] = rgb_ref[...]
    k_pad = enc_ref.shape[0]
    if k_pad > base + 3:                         # zero the padded scratch rows
        enc_ref[base + 3:, :] = jnp.zeros((k_pad - base - 3, tlen), f32)

    # --- MLP: single K=48 first-layer matmul, bf16 activations --------------
    enc = enc_ref[...].astype(bf16)                                   # (48, T)
    h = jnp.dot(w0_ref[...], enc, preferred_element_type=f32)         # (H, T)
    h = jnp.maximum(h + b0_ref[...], 0.0).astype(bf16)
    for l in range(wh_ref.shape[0]):
        a = jnp.dot(wh_ref[l], h, preferred_element_type=f32)
        h = jnp.maximum(a + bh_ref[l], 0.0).astype(bf16)
    z_mlp = jnp.dot(wo_ref[...], h, preferred_element_type=f32) + bo_ref[...]

    # --- gaussian-weighted confidence mean: M scalar FMAs on the VPU --------
    conf = scal_ref[_S_GW] * cp_ref[0:1, :]
    for k in range(1, cp_ref.shape[0]):
        conf = conf + scal_ref[_S_GW + k] * cp_ref[k:k + 1, :]

    # --- depth update + clamp (torch: z_out[z_out < 0.05] = 0.05) -----------
    z_new = z + jnp.maximum(conf, 0.0) * z_mlp
    z_new = jnp.maximum(z_new, 0.05)

    # --- fused forward transform epilogue (px -> m -> rigid -> px) ----------
    x_m = (x - scal_ref[_S_CX_Q]) * z_new * scal_ref[_S_INV_FX_Q]
    y_m = (y - scal_ref[_S_CY_Q]) * z_new * scal_ref[_S_INV_FY_Q]

    def t(r, cidx):
        return scal_ref[_S_T + 4 * r + cidx]

    xt = t(0, 0) * x_m + t(0, 1) * y_m + t(0, 2) * z_new + t(0, 3)
    yt = t(1, 0) * x_m + t(1, 1) * y_m + t(1, 2) * z_new + t(1, 3)
    zt = t(2, 0) * x_m + t(2, 1) * y_m + t(2, 2) * z_new + t(2, 3)
    inv_zt = 1.0 / zt        # exact: these coords feed bilinear resampling
    out_ref[0:1, :] = yt * scal_ref[_S_FY_R] * inv_zt + scal_ref[_S_CY_R]
    out_ref[1:2, :] = xt * scal_ref[_S_FX_R] * inv_zt + scal_ref[_S_CX_R]
    out_ref[2:3, :] = zt


def _choose_tile(n, max_tile=8192, megacore_threshold=1024):
    """Single big tile for small/latency-bound N; >= 2 grid steps for large N
    so the "parallel" axis can be sharded across v7x's two TensorCores.
    VMEM at tile=8192 is ~3 MB total, far below every generation's limit."""
    n128 = _round_up(n, 128)
    if n128 <= megacore_threshold:
        tile = n128
    else:
        tile = min(max_tile, _round_up(_cdiv(n128, 2), 128))
    n_pad = _round_up(n128, tile)
    return tile, n_pad, n_pad // tile


def mlp_fused_pallas(yxz, noise, rgb_c, conf_patch, scal, kp, num_enc):
    """All per-ray inputs are channel-first with rays on the last (lane) axis.

    yxz        (3, N) raw [y_px, x_px, z] of the backward-transformed rays
    noise      (2, N) 0.05 * randn noise added to (y, x) before /dims
    rgb_c      (3, N) center-pixel RGB
    conf_patch (M, N) confidence patch samples (M = patch_size**2)
    scal       (26+M,) SMEM scalar vector (see _S_* layout)
    Returns (3, N) [y', x', z'] after the fused forward transform.
    """
    n = yxz.shape[1]
    tile, n_pad, steps = _choose_tile(n)
    pad = n_pad - n
    if pad:
        yxz = jnp.pad(yxz, ((0, 0), (0, pad)), constant_values=1.0)
        noise = jnp.pad(noise, ((0, 0), (0, pad)))
        rgb_c = jnp.pad(rgb_c, ((0, 0), (0, pad)))
        conf_patch = jnp.pad(conf_patch, ((0, 0), (0, pad)))
    m = conf_patch.shape[0]
    k_pad = kp['w0'].shape[1]

    def ray_spec(ch):
        return pl.BlockSpec((ch, tile), lambda i: (0, i))

    out = pl.pallas_call(
        functools.partial(mlp_fused_kernel, num_enc),
        out_shape=jax.ShapeDtypeStruct((3, n_pad), jnp.float32),
        grid=(steps,),
        in_specs=[
            pl.BlockSpec(memory_space=pltpu.MemorySpace.SMEM),   # scalar vector
            ray_spec(3), ray_spec(2), ray_spec(3), ray_spec(m),
            _full_spec(kp['w0']), _full_spec(kp['b0']),
            _full_spec(kp['wh']), _full_spec(kp['bh']),
            _full_spec(kp['wo']), _full_spec(kp['bo']),
        ],
        out_specs=pl.BlockSpec((3, tile), lambda i: (0, i)),
        scratch_shapes=[pltpu.VMEM((k_pad, tile), jnp.float32)],
        compiler_params=pltpu.CompilerParams(dimension_semantics=("parallel",)),
    )(scal.astype(jnp.float32),
      yxz.astype(jnp.float32), noise.astype(jnp.float32),
      rgb_c.astype(jnp.float32), conf_patch.astype(jnp.float32),
      kp['w0'], kp['b0'], kp['wh'], kp['bh'], kp['wo'], kp['bo'])
    return out[:, :n]


# ----------------------------------------------------------------------------
# Plain-JAX glue (reconstructed helpers)
# ----------------------------------------------------------------------------
def gkern(l, sig):
    ax = jnp.arange(-(l - 1) / 2.0, (l - 1) / 2.0 + 1.0, dtype=jnp.float32)
    gauss = jnp.exp(-0.5 * (ax / sig) ** 2)
    k = jnp.outer(gauss, gauss)
    return k / jnp.sum(k)


def get_initial_conf(img):
    """Blurred image gradient to initialise confidence. img: (1,3,H,W)."""
    h, w = img.shape[-2:]
    edge = jnp.array([[-1., -1., -1.], [-1., 8., -1.], [-1., -1., -1.]], jnp.float32)
    edge = jnp.tile(edge[None, None], (1, 3, 1, 1))
    gaus = gkern(25, 15)[None, None]
    dn = ('NCHW', 'OIHW', 'NCHW')
    conf = jnp.abs(lax.conv_general_dilated(img, edge, (1, 1), 'VALID', dimension_numbers=dn))
    conf = lax.reduce_window(conf, -jnp.inf, lax.max, (1, 1, 4, 4), (1, 1, 4, 4), 'VALID')
    conf = lax.conv_general_dilated(conf, gaus, (1, 1), 'VALID', dimension_numbers=dn)
    conf = jimage.resize(conf, (1, 1, h, w), method='nearest')
    conf = 1e-05 + conf / jnp.max(conf) * 0.02
    return conf.astype(jnp.float32)


def get_random_coords(key, args):
    r = (args['coord_patch_size'] - 1) // 2
    k1, k2 = jax.random.split(key)
    y = (args['height'] - 2 * r) * jax.random.uniform(k1, (args['batch_size'], args['num_rays'])) + r
    x = (args['width'] - 2 * r) * jax.random.uniform(k2, (args['batch_size'], args['num_rays'])) + r
    return jnp.stack((x, y), axis=1)     # (B, 2, N) channels [x, y]


def bilinear_sample(img, x, y):
    """img: (C,H,W); x,y: (...). Returns (C, ...)."""
    _, h, w = img.shape
    x0 = jnp.floor(x); y0 = jnp.floor(y)
    wx = x - x0; wy = y - y0
    x0i = jnp.clip(x0, 0, w - 1).astype(jnp.int32)
    x1i = jnp.clip(x0 + 1, 0, w - 1).astype(jnp.int32)
    y0i = jnp.clip(y0, 0, h - 1).astype(jnp.int32)
    y1i = jnp.clip(y0 + 1, 0, h - 1).astype(jnp.int32)
    v00 = img[:, y0i, x0i]; v01 = img[:, y0i, x1i]
    v10 = img[:, y1i, x0i]; v11 = img[:, y1i, x1i]
    return (v00 * (1 - wy) * (1 - wx) + v01 * (1 - wy) * wx
            + v10 * wy * (1 - wx) + v11 * wy * wx)


def make_patch_offsets(p):
    r = (p - 1) // 2
    off = jnp.arange(p, dtype=jnp.float32) - r
    dy, dx = jnp.meshgrid(off, off, indexing='ij')
    return dy.reshape(-1), dx.reshape(-1)


def to_rays(depth, img, coords, patch_size):
    """coords: (1,2,N) channels [x,y] -> rays (1, 4+3P^2, N) rows [y,x,z,1,rgb]."""
    x = coords[0, 0]; y = coords[0, 1]
    z = bilinear_sample(depth[0], x, y)[0]
    dy, dx = make_patch_offsets(patch_size)
    px = x[None, :] + dx[:, None]
    py = y[None, :] + dy[:, None]
    rgb = bilinear_sample(img[0], px, py)                       # (3, M, N)
    rgb = rgb.reshape(3 * patch_size ** 2, x.shape[0])
    ones = jnp.ones((1, x.shape[0]), jnp.float32)
    return jnp.concatenate([y[None], x[None], z[None], ones, rgb], axis=0)[None]


def resample_rgb(rays, img, patch_size):
    y = rays[0, 0]; x = rays[0, 1]
    dy, dx = make_patch_offsets(patch_size)
    px = x[None, :] + dx[:, None]
    py = y[None, :] + dy[:, None]
    rgb = bilinear_sample(img[0], px, py).reshape(3 * patch_size ** 2, -1)
    return rays.at[0, 4:].set(rgb)


def patch_grid_sampler(conf_map, coords_yx, patch_size):
    """conf_map (1,1,H,W), coords_yx (1,2,N) [y,x] -> (1, P^2, N)."""
    y = coords_yx[0, 0]; x = coords_yx[0, 1]
    dy, dx = make_patch_offsets(patch_size)
    px = x[None, :] + dx[:, None]
    py = y[None, :] + dy[:, None]
    return bilinear_sample(conf_map[0], px, py)                 # (1, M, N)


def intrinsics_to_vec(k):
    return jnp.stack([k[0, 0], k[1, 1], k[0, 2], k[1, 2]]).astype(jnp.float32)


def ray_px_to_px_jnp(yxz, transform, intr_in, intr_out):
    """px -> metric -> rigid transform -> px, channel-first (3, N).
    Plain jnp (review item #4): at N=256 a standalone pallas_call is pure
    launch overhead; XLA fuses this with the surrounding gathers."""
    y, x, z = yxz[0], yxz[1], yxz[2]
    x_m = (x - intr_in[2]) * z / intr_in[0]
    y_m = (y - intr_in[3]) * z / intr_in[1]
    pm = jnp.stack([x_m, y_m, z, jnp.ones_like(z)], axis=0)     # (4, N)
    pt = transform @ pm
    xt, yt, zt = pt[0], pt[1], pt[2]
    y_px = yt * intr_out[1] / zt + intr_out[3]
    x_px = xt * intr_out[0] / zt + intr_out[2]
    return jnp.stack([y_px, x_px, zt], axis=0)


def init_mlp(key, in_f, hid, nhl, out_f=1):
    k0, k1, k2 = jax.random.split(key, 3)
    w0 = 0.1 * jax.random.normal(k0, (in_f, hid), jnp.float32)
    b0 = jnp.zeros((1, hid), jnp.float32)
    wh = 0.1 * jax.random.normal(k1, (nhl, hid, hid), jnp.float32)
    bh = jnp.zeros((nhl, 1, hid), jnp.float32)
    wo = 0.1 * jax.random.normal(k2, (hid, out_f), jnp.float32)
    bo = jnp.zeros((1, out_f), jnp.float32)
    return (w0, b0, wh, bh, wo, bo)


def prepare_mlp_kernel_params(params):
    """Pre-transpose / pre-pad weights into the lane-dense kernel layout.
    The first layer is flattened to a single (H, K_pad) bf16 matrix whose
    column order matches the in-kernel feature rows:
      [identity(y,x,z), sin(2^i*·), cos(2^i*·) per freq, rgb, zero-pad]."""
    w0, b0, wh, bh, wo, bo = params
    in_f = w0.shape[0]
    k_pad = _round_up(in_f, 8)
    w0_flat = jnp.pad(w0.T, ((0, 0), (0, k_pad - in_f)))
    return dict(
        w0=w0_flat.astype(jnp.bfloat16),                        # (H, K_pad)
        b0=b0.T.astype(jnp.float32),                            # (H, 1)
        wh=jnp.transpose(wh, (0, 2, 1)).astype(jnp.bfloat16),   # (L, H, H)
        bh=jnp.transpose(bh, (0, 2, 1)).astype(jnp.float32),    # (L, H, 1)
        wo=wo.T.astype(jnp.bfloat16),                           # (1, H)
        bo=bo.astype(jnp.float32),                              # (1, 1)
    )


def build_scalars(dims_hw, intr_qry, intr_ref, forward_transform, gw_mean_flat):
    """Pack every scalar the fused kernel needs into one 1-D SMEM vector."""
    return jnp.concatenate([
        1.0 / dims_hw,                                           # [0:2]
        jnp.stack([1.0 / intr_qry[0], 1.0 / intr_qry[1],
                   intr_qry[2], intr_qry[3]]),                   # [2:6]
        intr_ref,                                                # [6:10]
        forward_transform.reshape(-1),                           # [10:26]
        gw_mean_flat,                                            # [26:26+M]
    ]).astype(jnp.float32)


# ----------------------------------------------------------------------------
# BundleRefinementModel forward
# ----------------------------------------------------------------------------
def bundle_forward(model, qry_img, qry_depth, qry_conf, qry_intrinsics, qry_idx,
                   coords, noise_key, ref=False):
    args = model['args']
    p = args['patch_size']
    m = p * p
    n_center = (m - 1) // 2

    qry_w2c = model['world_to_cameras'][qry_idx][0]
    forward_transform = qry_w2c @ model['ref_camera_to_world']
    backward_transform = jnp.linalg.inv(forward_transform)
    if ref:
        forward_transform = backward_transform = jnp.eye(4, dtype=jnp.float32)

    intr_qry = intrinsics_to_vec(qry_intrinsics)
    intr_ref = intrinsics_to_vec(model['ref_intrinsics'])

    qry_rays = to_rays(qry_depth, qry_img, coords, patch_size=p)    # (1, 4+3M, N)

    # Backward px->m->rigid->px: plain jnp, fused by XLA with the gathers.
    yxz_t = ray_px_to_px_jnp(qry_rays[0, :3], backward_transform, intr_qry, intr_ref)
    ref_from_qry_rays = qry_rays.at[0, :3].set(yxz_t)
    ref_from_qry_rays = resample_rgb(ref_from_qry_rays, model['ref_img'], p)

    conf_patch = patch_grid_sampler(model['confidence'], ref_from_qry_rays[:, :2], p)

    # Fused Pallas kernel: PE + MLP + gaussian confidence + depth update/clamp
    # + forward px->m->rigid->px transform.
    rgb_c = ref_from_qry_rays[0, jnp.array([4 + n_center,
                                            4 + n_center + m,
                                            4 + n_center + 2 * m])]
    n_rays = ref_from_qry_rays.shape[-1]
    noise = 0.05 * jax.random.normal(noise_key, (2, n_rays), jnp.float32)
    scal = build_scalars(model['dims_hw'], intr_qry, intr_ref, forward_transform,
                         model['gw_mean_flat'])
    yxz_out = mlp_fused_pallas(ref_from_qry_rays[0, :3], noise, rgb_c,
                               conf_patch[0], scal, model['mlp_kernel_params'],
                               args['num_encoding_functions'])

    mlp_rays = ref_from_qry_rays.at[0, :3].set(yxz_out)
    mlp_rays = resample_rgb(mlp_rays, qry_img, p)

    return ref_from_qry_rays, qry_rays, mlp_rays, qry_conf


# ----------------------------------------------------------------------------
# Pure-JAX f32 reference of the fused kernel (for the unit check)
# ----------------------------------------------------------------------------
def reference_fused(params, gw_mean, dims_hw, yxz, noise, rgb_c, conf_patch,
                    num_enc, fwd_t, intr_q, intr_r):
    w0, b0, wh, bh, wo, bo = params
    y, x, z = yxz[0:1], yxz[1:2], yxz[2:3]
    pts = jnp.concatenate([(y + noise[0:1]) / dims_hw[0],
                           (x + noise[1:2]) / dims_hw[1], z], axis=0)
    feats = [pts]
    for i in range(num_enc):
        feats.append(jnp.sin((2.0 ** i) * pts))
        feats.append(jnp.cos((2.0 ** i) * pts))
    feats.append(rgb_c)
    mlp_in = jnp.concatenate(feats, axis=0)                      # (42, N)
    h = jnp.maximum(w0.T @ mlp_in + b0.T, 0.0)
    for l in range(wh.shape[0]):
        h = jnp.maximum(wh[l].T @ h + bh[l].T, 0.0)
    z_mlp = wo.T @ h + bo.T                                      # (1, N)
    conf = jnp.sum(gw_mean[:, None] * conf_patch, axis=0, keepdims=True)
    z_new = jnp.maximum(z + jnp.maximum(conf, 0.0) * z_mlp, 0.05)
    return ray_px_to_px_jnp(jnp.concatenate([y, x, z_new], axis=0),
                            fwd_t, intr_q, intr_r)


# ----------------------------------------------------------------------------
# Main
# ----------------------------------------------------------------------------
if __name__ == "__main__":
    key = jax.random.PRNGKey(0)
    k_img, k_depth, k_mlp, k_coords, k_noise = jax.random.split(key, 5)

    H = W = 128
    args = dict(height=H, width=W, patch_size=3, coord_patch_size=3,
                num_encoding_functions=6, num_hidden_layers=2, hidden_features=32,
                batch_size=1, num_rays=256)
    p = args['patch_size']

    # synthetic "bundle_dataset"
    ref_img = jax.random.uniform(k_img, (1, 3, H, W), jnp.float32)
    ref_depth = 1.0 + 2.0 * jax.random.uniform(k_depth, (1, 1, H, W), jnp.float32)
    ref_intrinsics = jnp.array([[100., 0., W / 2.],
                                [0., 100., H / 2.],
                                [0., 0., 1.]], jnp.float32)
    ref_camera_to_world = jnp.eye(4, dtype=jnp.float32)
    w2c0 = jnp.array([[1., 0., 0., 0.10],
                      [0., 1., 0., -0.05],
                      [0., 0., 1., 0.15],
                      [0., 0., 0., 1.]], jnp.float32)
    world_to_cameras = jnp.stack([w2c0, jnp.eye(4, dtype=jnp.float32)], axis=0)

    in_features = (2 * args['num_encoding_functions'] + 1) * 3 + 3   # 42
    mlp_params = init_mlp(k_mlp, in_features, args['hidden_features'],
                          args['num_hidden_layers'])

    model = dict(
        args=args,
        world_to_cameras=world_to_cameras,
        ref_camera_to_world=ref_camera_to_world,
        ref_intrinsics=ref_intrinsics,
        ref_depth=ref_depth,
        ref_img=ref_img,
        confidence=get_initial_conf(ref_img),
        # gaussian weights / M so that sum(gw_mean*patch) == mean(gw*patch, dim=1)
        gw_mean_flat=(gkern(p, p / 5.0).reshape(-1) / float(p * p)).astype(jnp.float32),
        dims_hw=jnp.array([H - 1.0, W - 1.0], jnp.float32),
        mlp_kernel_params=prepare_mlp_kernel_params(mlp_params),
    )

    coords = get_random_coords(k_coords, args)          # (1, 2, 256)
    qry_conf = jnp.ones_like(ref_depth)

    # --- full forward --------------------------------------------------------
    forward_fn = jax.jit(functools.partial(bundle_forward, model))
    outs = jax.block_until_ready(forward_fn(ref_img, ref_depth, qry_conf,
                                            ref_intrinsics, jnp.array([0]),
                                            coords, k_noise))
    ref_from_qry_rays, qry_rays, mlp_rays, qry_conf_out = outs
    assert mlp_rays.shape == (1, 4 + 3 * p * p, args['num_rays'])
    assert bool(jnp.all(jnp.isfinite(mlp_rays)))
    assert bool(jnp.all(mlp_rays[:, 2] > 0.0))

    # --- unit check: fused Pallas kernel vs pure-JAX f32 reference -----------
    kt = jax.random.split(jax.random.PRNGKey(1), 6)
    n_t = args['num_rays']
    yxz_t = jnp.stack([
        jax.random.uniform(kt[0], (n_t,), minval=1.0, maxval=H - 2.0),
        jax.random.uniform(kt[1], (n_t,), minval=1.0, maxval=W - 2.0),
        jax.random.uniform(kt[2], (n_t,), minval=1.0, maxval=3.0)])
    noise_t = 0.05 * jax.random.normal(kt[3], (2, n_t), jnp.float32)
    rgb_t = jax.random.uniform(kt[4], (3, n_t), jnp.float32)
    conf_t = 0.02 * jax.random.uniform(kt[5], (p * p, n_t), jnp.float32)
    fwd_t = w2c0 @ ref_camera_to_world
    intr_v = intrinsics_to_vec(ref_intrinsics)
    scal_t = build_scalars(model['dims_hw'], intr_v, intr_v, fwd_t,
                           model['gw_mean_flat'])
    out_k = mlp_fused_pallas(yxz_t, noise_t, rgb_t, conf_t, scal_t,
                             model['mlp_kernel_params'],
                             args['num_encoding_functions'])
    out_r = reference_fused(mlp_params, model['gw_mean_flat'], model['dims_hw'],
                            yxz_t, noise_t, rgb_t, conf_t,
                            args['num_encoding_functions'], fwd_t, intr_v, intr_v)
    out_k, out_r = jax.block_until_ready((out_k, out_r))
    err = float(jnp.max(jnp.abs(out_k - out_r)))
    assert err < 1e-2, f"fused kernel mismatch vs reference: {err}"

    print("KERNEL_OK")
</pallas_src>

<mosaic_0001>
module attributes {stable_mosaic.version = 11 : i64} {
  func.func private @main(%arg0: i32) attributes {dimension_semantics = [#tpu.dimension_semantics<core_parallel>], iteration_bounds = array<i64: 2>, tpu.core_type = #tpu.core_type<sc_scalar_subcore>, window_params = []} {
    return
  }
}

module attributes {stable_mosaic.version = 11 : i64} {
  func.func private @main(%arg0: i32) attributes {dimension_semantics = [#tpu.dimension_semantics<core_parallel>], iteration_bounds = array<i64: 2>, tpu.core_type = #tpu.core_type<sc_scalar_subcore>, window_params = []} {
    return
  }
}

module attributes {stable_mosaic.version = 11 : i64} {
  func.func @mlp_fused_kernel(%arg0: i32, %arg1: memref<35xf32, #tpu.memory_space<smem>>, %arg2: memref<3x256xf32, #tpu.memory_space<vmem>>, %arg3: memref<2x256xf32, #tpu.memory_space<vmem>>, %arg4: memref<3x256xf32, #tpu.memory_space<vmem>>, %arg5: memref<9x256xf32, #tpu.memory_space<vmem>>, %arg6: memref<32x48xbf16, #tpu.memory_space<vmem>>, %arg7: memref<32x1xf32, #tpu.memory_space<vmem>>, %arg8: memref<2x32x32xbf16, #tpu.memory_space<vmem>>, %arg9: memref<2x32x1xf32, #tpu.memory_space<vmem>>, %arg10: memref<1x32xbf16, #tpu.memory_space<vmem>>, %arg11: memref<1x1xf32, #tpu.memory_space<vmem>>, %arg12: memref<3x256xf32, #tpu.memory_space<vmem>>, %arg13: memref<48x256xf32, #tpu.memory_space<vmem>>) attributes {dimension_semantics = [#tpu.dimension_semantics<parallel>], iteration_bounds = array<i64: 1>, scalar_prefetch = 0 : i64, scratch_operands = 1 : i64, tpu.core_type = #tpu.core_type<tc>, window_params = [{transform_indices = @transform_0, window_bounds = array<i64: 35>}, {transform_indices = @transform_1, window_bounds = array<i64: 3, 256>}, {transform_indices = @transform_2, window_bounds = array<i64: 2, 256>}, {transform_indices = @transform_3, window_bounds = array<i64: 3, 256>}, {transform_indices = @transform_4, window_bounds = array<i64: 9, 256>}, {pipeline_mode = #tpu.pipeline_mode<synchronous>, transform_indices = @transform_5, window_bounds = array<i64: 32, 48>}, {pipeline_mode = #tpu.pipeline_mode<synchronous>, transform_indices = @transform_6, window_bounds = array<i64: 32, 1>}, {pipeline_mode = #tpu.pipeline_mode<synchronous>, transform_indices = @transform_7, window_bounds = array<i64: 2, 32, 32>}, {pipeline_mode = #tpu.pipeline_mode<synchronous>, transform_indices = @transform_8, window_bounds = array<i64: 2, 32, 1>}, {pipeline_mode = #tpu.pipeline_mode<synchronous>, transform_indices = @transform_9, window_bounds = array<i64: 1, 32>}, {pipeline_mode = #tpu.pipeline_mode<synchronous>, transform_indices = @transform_10, window_bounds = array<i64: 1, 1>}, {transform_indices = @transform_11, window_bounds = array<i64: 3, 256>}]} {
    %c0 = arith.constant 0 : index
    %c0_0 = arith.constant 0 : index
    %0 = vector.load %arg2[%c0, %c0_0] : memref<3x256xf32, #tpu.memory_space<vmem>>, vector<1x256xf32>
    %c1 = arith.constant 1 : index
    %c0_1 = arith.constant 0 : index
    %1 = vector.load %arg2[%c1, %c0_1] : memref<3x256xf32, #tpu.memory_space<vmem>>, vector<1x256xf32>
    %c2 = arith.constant 2 : index
    %c0_2 = arith.constant 0 : index
    %2 = vector.load %arg2[%c2, %c0_2] : memref<3x256xf32, #tpu.memory_space<vmem>>, vector<1x256xf32>
    %c0_3 = arith.constant 0 : index
    %c0_4 = arith.constant 0 : index
    %3 = vector.load %arg3[%c0_3, %c0_4] : memref<2x256xf32, #tpu.memory_space<vmem>>, vector<1x256xf32>
    %4 = arith.addf %0, %3 : vector<1x256xf32>
    %c0_5 = arith.constant 0 : index
    %5 = memref.load %arg1[%c0_5] : memref<35xf32, #tpu.memory_space<smem>>
    %6 = vector.broadcast %5 : f32 to vector<1x256xf32>
    %7 = arith.mulf %4, %6 : vector<1x256xf32>
    %c0_6 = arith.constant 0 : index
    %c0_7 = arith.constant 0 : index
    %8 = vector.load %arg13[%c0_6, %c0_7] : memref<48x256xf32, #tpu.memory_space<vmem>>, vector<1x256xf32>
    tpu.vector_store %arg13[%c0_6, %c0_7], %7 {strides = array<i32>} : memref<48x256xf32, #tpu.memory_space<vmem>>, vector<1x256xf32>,
    %c1_8 = arith.constant 1 : index
    %c0_9 = arith.constant 0 : index
    %9 = vector.load %arg3[%c1_8, %c0_9] : memref<2x256xf32, #tpu.memory_space<vmem>>, vector<1x256xf32>
    %10 = arith.addf %1, %9 : vector<1x256xf32>
    %c1_10 = arith.constant 1 : index
    %11 = memref.load %arg1[%c1_10] : memref<35xf32, #tpu.memory_space<smem>>
    %12 = vector.broadcast %11 : f32 to vector<1x256xf32>
    %13 = arith.mulf %10, %12 : vector<1x256xf32>
    %c1_11 = arith.constant 1 : index
    %c0_12 = arith.constant 0 : index
    %14 = vector.load %arg13[%c1_11, %c0_12] : memref<48x256xf32, #tpu.memory_space<vmem>>, vector<1x256xf32>
    tpu.vector_store %arg13[%c1_11, %c0_12], %13 {strides = array<i32>} : memref<48x256xf32, #tpu.memory_space<vmem>>, vector<1x256xf32>,
    %c2_13 = arith.constant 2 : index
    %c0_14 = arith.constant 0 : index
    %15 = vector.load %arg13[%c2_13, %c0_14] : memref<48x256xf32, #tpu.memory_space<vmem>>, vector<1x256xf32>
    tpu.vector_store %arg13[%c2_13, %c0_14], %2 {strides = array<i32>} : memref<48x256xf32, #tpu.memory_space<vmem>>, vector<1x256xf32>,
    %c0_15 = arith.constant 0 : index
    %c0_16 = arith.constant 0 : index
    %16 = vector.load %arg13[%c0_15, %c0_16] : memref<48x256xf32, #tpu.memory_space<vmem>>, vector<3x256xf32>
    %17 = math.sin %16 : vector<3x256xf32>
    %18 = math.cos %16 : vector<3x256xf32>
    %c3 = arith.constant 3 : index
    %c0_17 = arith.constant 0 : index
    %19 = vector.load %arg13[%c3, %c0_17] : memref<48x256xf32, #tpu.memory_space<vmem>>, vector<3x256xf32>
    tpu.vector_store %arg13[%c3, %c0_17], %17 {strides = array<i32>} : memref<48x256xf32, #tpu.memory_space<vmem>>, vector<3x256xf32>,
    %c6 = arith.constant 6 : index
    %c0_18 = arith.constant 0 : index
    %20 = vector.load %arg13[%c6, %c0_18] : memref<48x256xf32, #tpu.memory_space<vmem>>, vector<3x256xf32>
    tpu.vector_store %arg13[%c6, %c0_18], %18 {strides = array<i32>} : memref<48x256xf32, #tpu.memory_space<vmem>>, vector<3x256xf32>,
    %cst = arith.constant 2.000000e+00 : f32
    %21 = vector.broadcast %cst : f32 to vector<3x256xf32>
    %22 = arith.mulf %21, %17 : vector<3x256xf32>
    %23 = arith.mulf %22, %18 : vector<3x256xf32>
    %cst_19 = arith.constant 2.000000e+00 : f32
    %24 = vector.broadcast %cst_19 : f32 to vector<3x256xf32>
    %25 = arith.mulf %24, %17 : vector<3x256xf32>
    %26 = arith.mulf %25, %17 : vector<3x256xf32>
    %cst_20 = arith.constant 1.000000e+00 : f32
    %27 = vector.broadcast %cst_20 : f32 to vector<3x256xf32>
    %28 = arith.subf %27, %26 : vector<3x256xf32>
    %c9 = arith.constant 9 : index
    %c0_21 = arith.constant 0 : index
    %29 = vector.load %arg13[%c9, %c0_21] : memref<48x256xf32, #tpu.memory_space<vmem>>, vector<3x256xf32>
    tpu.vector_store %arg13[%c9, %c0_21], %23 {strides = array<i32>} : memref<48x256xf32, #tpu.memory_space<vmem>>, vector<3x256xf32>,
    %c12 = arith.constant 12 : index
    %c0_22 = arith.constant 0 : index
    %30 = vector.load %arg13[%c12, %c0_22] : memref<48x256xf32, #tpu.memory_space<vmem>>, vector<3x256xf32>
    tpu.vector_store %arg13[%c12, %c0_22], %28 {strides = array<i32>} : memref<48x256xf32, #tpu.memory_space<vmem>>, vector<3x256xf32>,
    %cst_23 = arith.constant 2.000000e+00 : f32
    %31 = vector.broadcast %cst_23 : f32 to vector<3x256xf32>
    %32 = arith.mulf %31, %23 : vector<3x256xf32>
    %33 = arith.mulf %32, %28 : vector<3x256xf32>
    %cst_24 = arith.constant 2.000000e+00 : f32
    %34 = vector.broadcast %cst_24 : f32 to vector<3x256xf32>
    %35 = arith.mulf %34, %23 : vector<3x256xf32>
    %36 = arith.mulf %35, %23 : vector<3x256xf32>
    %cst_25 = arith.constant 1.000000e+00 : f32
    %37 = vector.broadcast %cst_25 : f32 to vector<3x256xf32>
    %38 = arith.subf %37, %36 : vector<3x256xf32>
    %c15 = arith.constant 15 : index
    %c0_26 = arith.constant 0 : index
    %39 = vector.load %arg13[%c15, %c0_26] : memref<48x256xf32, #tpu.memory_space<vmem>>, vector<3x256xf32>
    tpu.vector_store %arg13[%c15, %c0_26], %33 {strides = array<i32>} : memref<48x256xf32, #tpu.memory_space<vmem>>, vector<3x256xf32>,
    %c18 = arith.constant 18 : index
    %c0_27 = arith.constant 0 : index
    %40 = vector.load %arg13[%c18, %c0_27] : memref<48x256xf32, #tpu.memory_space<vmem>>, vector<3x256xf32>
    tpu.vector_store %arg13[%c18, %c0_27], %38 {strides = array<i32>} : memref<48x256xf32, #tpu.memory_space<vmem>>, vector<3x256xf32>,
    %cst_28 = arith.constant 2.000000e+00 : f32
    %41 = vector.broadcast %cst_28 : f32 to vector<3x256xf32>
    %42 = arith.mulf %41, %33 : vector<3x256xf32>
    %43 = arith.mulf %42, %38 : vector<3x256xf32>
    %cst_29 = arith.constant 2.000000e+00 : f32
    %44 = vector.broadcast %cst_29 : f32 to vector<3x256xf32>
    %45 = arith.mulf %44, %33 : vector<3x256xf32>
    %46 = arith.mulf %45, %33 : vector<3x256xf32>
    %cst_30 = arith.constant 1.000000e+00 : f32
    %47 = vector.broadcast %cst_30 : f32 to vector<3x256xf32>
    %48 = arith.subf %47, %46 : vector<3x256xf32>
    %c21 = arith.constant 21 : index
    %c0_31 = arith.constant 0 : index
    %49 = vector.load %arg13[%c21, %c0_31] : memref<48x256xf32, #tpu.memory_space<vmem>>, vector<3x256xf32>
    tpu.vector_store %arg13[%c21, %c0_31], %43 {strides = array<i32>} : memref<48x256xf32, #tpu.memory_space<vmem>>, vector<3x256xf32>,
    %c24 = arith.constant 24 : index
    %c0_32 = arith.constant 0 : index
    %50 = vector.load %arg13[%c24, %c0_32] : memref<48x256xf32, #tpu.memory_space<vmem>>, vector<3x256xf32>
    tpu.vector_store %arg13[%c24, %c0_32], %48 {strides = array<i32>} : memref<48x256xf32, #tpu.memory_space<vmem>>, vector<3x256xf32>,
    %cst_33 = arith.constant 2.000000e+00 : f32
    %51 = vector.broadcast %cst_33 : f32 to vector<3x256xf32>
    %52 = arith.mulf %51, %43 : vector<3x256xf32>
    %53 = arith.mulf %52, %48 : vector<3x256xf32>
    %cst_34 = arith.constant 2.000000e+00 : f32
    %54 = vector.broadcast %cst_34 : f32 to vector<3x256xf32>
    %55 = arith.mulf %54, %43 : vector<3x256xf32>
    %56 = arith.mulf %55, %43 : vector<3x256xf32>
    %cst_35 = arith.constant 1.000000e+00 : f32
    %57 = vector.broadcast %cst_35 : f32 to vector<3x256xf32>
    %58 = arith.subf %57, %56 : vector<3x256xf32>
    %c27 = arith.constant 27 : index
    %c0_36 = arith.constant 0 : index
    %59 = vector.load %arg13[%c27, %c0_36] : memref<48x256xf32, #tpu.memory_space<vmem>>, vector<3x256xf32>
    tpu.vector_store %arg13[%c27, %c0_36], %53 {strides = array<i32>} : memref<48x256xf32, #tpu.memory_space<vmem>>, vector<3x256xf32>,
    %c30 = arith.constant 30 : index
    %c0_37 = arith.constant 0 : index
    %60 = vector.load %arg13[%c30, %c0_37] : memref<48x256xf32, #tpu.memory_space<vmem>>, vector<3x256xf32>
    tpu.vector_store %arg13[%c30, %c0_37], %58 {strides = array<i32>} : memref<48x256xf32, #tpu.memory_space<vmem>>, vector<3x256xf32>,
    %cst_38 = arith.constant 2.000000e+00 : f32
    %61 = vector.broadcast %cst_38 : f32 to vector<3x256xf32>
    %62 = arith.mulf %61, %53 : vector<3x256xf32>
    %63 = arith.mulf %62, %58 : vector<3x256xf32>
    %cst_39 = arith.constant 2.000000e+00 : f32
    %64 = vector.broadcast %cst_39 : f32 to vector<3x256xf32>
    %65 = arith.mulf %64, %53 : vector<3x256xf32>
    %66 = arith.mulf %65, %53 : vector<3x256xf32>
    %cst_40 = arith.constant 1.000000e+00 : f32
    %67 = vector.broadcast %cst_40 : f32 to vector<3x256xf32>
    %68 = arith.subf %67, %66 : vector<3x256xf32>
    %c33 = arith.constant 33 : index
    %c0_41 = arith.constant 0 : index
    %69 = vector.load %arg13[%c33, %c0_41] : memref<48x256xf32, #tpu.memory_space<vmem>>, vector<3x256xf32>
    tpu.vector_store %arg13[%c33, %c0_41], %63 {strides = array<i32>} : memref<48x256xf32, #tpu.memory_space<vmem>>, vector<3x256xf32>,
    %c36 = arith.constant 36 : index
    %c0_42 = arith.constant 0 : index
    %70 = vector.load %arg13[%c36, %c0_42] : memref<48x256xf32, #tpu.memory_space<vmem>>, vector<3x256xf32>
    tpu.vector_store %arg13[%c36, %c0_42], %68 {strides = array<i32>} : memref<48x256xf32, #tpu.memory_space<vmem>>, vector<3x256xf32>,
    %c0_43 = arith.constant 0 : index
    %c0_44 = arith.constant 0 : index
    %71 = vector.load %arg4[%c0_43, %c0_44] : memref<3x256xf32, #tpu.memory_space<vmem>>, vector<3x256xf32>
    %c39 = arith.constant 39 : index
    %c0_45 = arith.constant 0 : index
    %72 = vector.load %arg13[%c39, %c0_45] : memref<48x256xf32, #tpu.memory_space<vmem>>, vector<3x256xf32>
    tpu.vector_store %arg13[%c39, %c0_45], %71 {strides = array<i32>} : memref<48x256xf32, #tpu.memory_space<vmem>>, vector<3x256xf32>,
    %cst_46 = arith.constant 0.000000e+00 : f32
    %73 = vector.broadcast %cst_46 : f32 to vector<6x256xf32>
    %c42 = arith.constant 42 : index
    %c0_47 = arith.constant 0 : index
    %74 = vector.load %arg13[%c42, %c0_47] : memref<48x256xf32, #tpu.memory_space<vmem>>, vector<6x256xf32>
    tpu.vector_store %arg13[%c42, %c0_47], %73 {strides = array<i32>} : memref<48x256xf32, #tpu.memory_space<vmem>>, vector<6x256xf32>,
    %c0_48 = arith.constant 0 : index
    %c0_49 = arith.constant 0 : index
    %75 = vector.load %arg13[%c0_48, %c0_49] : memref<48x256xf32, #tpu.memory_space<vmem>>, vector<48x256xf32>
    %76 = arith.truncf %75 : vector<48x256xf32> to vector<48x256xbf16>
    %c0_50 = arith.constant 0 : index
    %c0_51 = arith.constant 0 : index
    %77 = vector.load %arg6[%c0_50, %c0_51] : memref<32x48xbf16, #tpu.memory_space<vmem>>, vector<32x48xbf16>
    %cst_52 = arith.constant dense<0.000000e+00> : vector<32x256xf32>
    %78 = tpu.matmul %77, %76, %cst_52 {dimension_numbers = #tpu.dot_dimension_numbers<[1], [0], [0], [1], [0, 0, 1, 1], [], []>} : vector<32x48xbf16>, vector<48x256xbf16>, vector<32x256xf32> -> vector<32x256xf32>
    %c0_53 = arith.constant 0 : index
    %c0_54 = arith.constant 0 : index
    %79 = vector.load %arg7[%c0_53, %c0_54] : memref<32x1xf32, #tpu.memory_space<vmem>>, vector<32x1xf32>
    %80 = vector.broadcast %79 : vector<32x1xf32> to vector<32x256xf32>
    %81 = arith.addf %78, %80 : vector<32x256xf32>
    %cst_55 = arith.constant 0.000000e+00 : f32
    %82 = vector.broadcast %cst_55 : f32 to vector<32x256xf32>
    %83 = arith.maximumf %81, %82 : vector<32x256xf32>
    %84 = arith.truncf %83 : vector<32x256xf32> to vector<32x256xbf16>
    %c0_56 = arith.constant 0 : index
    %c0_57 = arith.constant 0 : index
    %c0_58 = arith.constant 0 : index
    %85 = vector.load %arg8[%c0_56, %c0_57, %c0_58] : memref<2x32x32xbf16, #tpu.memory_space<vmem>>, vector<1x32x32xbf16>
    %86 = vector.shape_cast %85 : vector<1x32x32xbf16> to vector<32x32xbf16>
    %cst_59 = arith.constant dense<0.000000e+00> : vector<32x256xf32>
    %87 = tpu.matmul %86, %84, %cst_59 {dimension_numbers = #tpu.dot_dimension_numbers<[1], [0], [0], [1], [0, 0, 1, 1], [], []>} : vector<32x32xbf16>, vector<32x256xbf16>, vector<32x256xf32> -> vector<32x256xf32>
    %c0_60 = arith.constant 0 : index
    %c0_61 = arith.constant 0 : index
    %c0_62 = arith.constant 0 : index
    %88 = vector.load %arg9[%c0_60, %c0_61, %c0_62] : memref<2x32x1xf32, #tpu.memory_space<vmem>>, vector<1x32x1xf32>
    %89 = vector.shape_cast %88 : vector<1x32x1xf32> to vector<32x1xf32>
    %90 = vector.broadcast %89 : vector<32x1xf32> to vector<32x256xf32>
    %91 = arith.addf %87, %90 : vector<32x256xf32>
    %cst_63 = arith.constant 0.000000e+00 : f32
    %92 = vector.broadcast %cst_63 : f32 to vector<32x256xf32>
    %93 = arith.maximumf %91, %92 : vector<32x256xf32>
    %94 = arith.truncf %93 : vector<32x256xf32> to vector<32x256xbf16>
    %c1_64 = arith.constant 1 : index
    %c0_65 = arith.constant 0 : index
    %c0_66 = arith.constant 0 : index
    %95 = vector.load %arg8[%c1_64, %c0_65, %c0_66] : memref<2x32x32xbf16, #tpu.memory_space<vmem>>, vector<1x32x32xbf16>
    %96 = vector.shape_cast %95 : vector<1x32x32xbf16> to vector<32x32xbf16>
    %cst_67 = arith.constant dense<0.000000e+00> : vector<32x256xf32>
    %97 = tpu.matmul %96, %94, %cst_67 {dimension_numbers = #tpu.dot_dimension_numbers<[1], [0], [0], [1], [0, 0, 1, 1], [], []>} : vector<32x32xbf16>, vector<32x256xbf16>, vector<32x256xf32> -> vector<32x256xf32>
    %c1_68 = arith.constant 1 : index
    %c0_69 = arith.constant 0 : index
    %c0_70 = arith.constant 0 : index
    %98 = vector.load %arg9[%c1_68, %c0_69, %c0_70] : memref<2x32x1xf32, #tpu.memory_space<vmem>>, vector<1x32x1xf32>
    %99 = vector.shape_cast %98 : vector<1x32x1xf32> to vector<32x1xf32>
    %100 = vector.broadcast %99 : vector<32x1xf32> to vector<32x256xf32>
    %101 = arith.addf %97, %100 : vector<32x256xf32>
    %cst_71 = arith.constant 0.000000e+00 : f32
    %102 = vector.broadcast %cst_71 : f32 to vector<32x256xf32>
    %103 = arith.maximumf %101, %102 : vector<32x256xf32>
    %104 = arith.truncf %103 : vector<32x256xf32> to vector<32x256xbf16>
    %c0_72 = arith.constant 0 : index
    %c0_73 = arith.constant 0 : index
    %105 = vector.load %arg10[%c0_72, %c0_73] : memref<1x32xbf16, #tpu.memory_space<vmem>>, vector<1x32xbf16>
    %cst_74 = arith.constant dense<0.000000e+00> : vector<1x256xf32>
    %106 = tpu.matmul %105, %104, %cst_74 {dimension_numbers = #tpu.dot_dimension_numbers<[1], [0], [0], [1], [0, 0, 1, 1], [], []>} : vector<1x32xbf16>, vector<32x256xbf16>, vector<1x256xf32> -> vector<1x256xf32>
    %c0_75 = arith.constant 0 : index
    %c0_76 = arith.constant 0 : index
    %107 = vector.load %arg11[%c0_75, %c0_76] : memref<1x1xf32, #tpu.memory_space<vmem>>, vector<1x1xf32>
    %108 = vector.broadcast %107 : vector<1x1xf32> to vector<1x256xf32>
    %109 = arith.addf %106, %108 : vector<1x256xf32>
    %c26 = arith.constant 26 : index
    %110 = memref.load %arg1[%c26] : memref<35xf32, #tpu.memory_space<smem>>
    %c0_77 = arith.constant 0 : index
    %c0_78 = arith.constant 0 : index
    %111 = vector.load %arg5[%c0_77, %c0_78] : memref<9x256xf32, #tpu.memory_space<vmem>>, vector<1x256xf32>
    %112 = vector.broadcast %110 : f32 to vector<1x256xf32>
    %113 = arith.mulf %112, %111 : vector<1x256xf32>
    %c27_79 = arith.constant 27 : index
    %114 = memref.load %arg1[%c27_79] : memref<35xf32, #tpu.memory_space<smem>>
    %c1_80 = arith.constant 1 : index
    %c0_81 = arith.constant 0 : index
    %115 = vector.load %arg5[%c1_80, %c0_81] : memref<9x256xf32, #tpu.memory_space<vmem>>, vector<1x256xf32>
    %116 = vector.broadcast %114 : f32 to vector<1x256xf32>
    %117 = arith.mulf %116, %115 : vector<1x256xf32>
    %118 = arith.addf %113, %117 : vector<1x256xf32>
    %c28 = arith.constant 28 : index
    %119 = memref.load %arg1[%c28] : memref<35xf32, #tpu.memory_space<smem>>
    %c2_82 = arith.constant 2 : index
    %c0_83 = arith.constant 0 : index
    %120 = vector.load %arg5[%c2_82, %c0_83] : memref<9x256xf32, #tpu.memory_space<vmem>>, vector<1x256xf32>
    %121 = vector.broadcast %119 : f32 to vector<1x256xf32>
    %122 = arith.mulf %121, %120 : vector<1x256xf32>
    %123 = arith.addf %118, %122 : vector<1x256xf32>
    %c29 = arith.constant 29 : index
    %124 = memref.load %arg1[%c29] : memref<35xf32, #tpu.memory_space<smem>>
    %c3_84 = arith.constant 3 : index
    %c0_85 = arith.constant 0 : index
    %125 = vector.load %arg5[%c3_84, %c0_85] : memref<9x256xf32, #tpu.memory_space<vmem>>, vector<1x256xf32>
    %126 = vector.broadcast %124 : f32 to vector<1x256xf32>
    %127 = arith.mulf %126, %125 : vector<1x256xf32>
    %128 = arith.addf %123, %127 : vector<1x256xf32>
    %c30_86 = arith.constant 30 : index
    %129 = memref.load %arg1[%c30_86] : memref<35xf32, #tpu.memory_space<smem>>
    %c4 = arith.constant 4 : index
    %c0_87 = arith.constant 0 : index
    %130 = vector.load %arg5[%c4, %c0_87] : memref<9x256xf32, #tpu.memory_space<vmem>>, vector<1x256xf32>
    %131 = vector.broadcast %129 : f32 to vector<1x256xf32>
    %132 = arith.mulf %131, %130 : vector<1x256xf32>
    %133 = arith.addf %128, %132 : vector<1x256xf32>
    %c31 = arith.constant 31 : index
    %134 = memref.load %arg1[%c31] : memref<35xf32, #tpu.memory_space<smem>>
    %c5 = arith.constant 5 : index
    %c0_88 = arith.constant 0 : index
    %135 = vector.load %arg5[%c5, %c0_88] : memref<9x256xf32, #tpu.memory_space<vmem>>, vector<1x256xf32>
    %136 = vector.broadcast %134 : f32 to vector<1x256xf32>
    %137 = arith.mulf %136, %135 : vector<1x256xf32>
    %138 = arith.addf %133, %137 : vector<1x256xf32>
    %c32 = arith.constant 32 : index
    %139 = memref.load %arg1[%c32] : memref<35xf32, #tpu.memory_space<smem>>
    %c6_89 = arith.constant 6 : index
    %c0_90 = arith.constant 0 : index
    %140 = vector.load %arg5[%c6_89, %c0_90] : memref<9x256xf32, #tpu.memory_space<vmem>>, vector<1x256xf32>
    %141 = vector.broadcast %139 : f32 to vector<1x256xf32>
    %142 = arith.mulf %141, %140 : vector<1x256xf32>
    %143 = arith.addf %138, %142 : vector<1x256xf32>
    %c33_91 = arith.constant 33 : index
    %144 = memref.load %arg1[%c33_91] : memref<35xf32, #tpu.memory_space<smem>>
    %c7 = arith.constant 7 : index
    %c0_92 = arith.constant 0 : index
    %145 = vector.load %arg5[%c7, %c0_92] : memref<9x256xf32, #tpu.memory_space<vmem>>, vector<1x256xf32>
    %146 = vector.broadcast %144 : f32 to vector<1x256xf32>
    %147 = arith.mulf %146, %145 : vector<1x256xf32>
    %148 = arith.addf %143, %147 : vector<1x256xf32>
    %c34 = arith.constant 34 : index
    %149 = memref.load %arg1[%c34] : memref<35xf32, #tpu.memory_space<smem>>
    %c8 = arith.constant 8 : index
    %c0_93 = arith.constant 0 : index
    %150 = vector.load %arg5[%c8, %c0_93] : memref<9x256xf32, #tpu.memory_space<vmem>>, vector<1x256xf32>
    %151 = vector.broadcast %149 : f32 to vector<1x256xf32>
    %152 = arith.mulf %151, %150 : vector<1x256xf32>
    %153 = arith.addf %148, %152 : vector<1x256xf32>
    %cst_94 = arith.constant 0.000000e+00 : f32
    %154 = vector.broadcast %cst_94 : f32 to vector<1x256xf32>
    %155 = arith.maximumf %153, %154 : vector<1x256xf32>
    %156 = arith.mulf %155, %109 : vector<1x256xf32>
    %157 = arith.addf %2, %156 : vector<1x256xf32>
    %cst_95 = arith.constant 5.000000e-02 : f32
    %158 = vector.broadcast %cst_95 : f32 to vector<1x256xf32>
    %159 = arith.maximumf %157, %158 : vector<1x256xf32>
    %c4_96 = arith.constant 4 : index
    %160 = memref.load %arg1[%c4_96] : memref<35xf32, #tpu.memory_space<smem>>
    %161 = vector.broadcast %160 : f32 to vector<1x256xf32>
    %162 = arith.subf %1, %161 : vector<1x256xf32>
    %163 = arith.mulf %162, %159 : vector<1x256xf32>
    %c2_97 = arith.constant 2 : index
    %164 = memref.load %arg1[%c2_97] : memref<35xf32, #tpu.memory_space<smem>>
    %165 = vector.broadcast %164 : f32 to vector<1x256xf32>
    %166 = arith.mulf %163, %165 : vector<1x256xf32>
    %c5_98 = arith.constant 5 : index
    %167 = memref.load %arg1[%c5_98] : memref<35xf32, #tpu.memory_space<smem>>
    %168 = vector.broadcast %167 : f32 to vector<1x256xf32>
    %169 = arith.subf %0, %168 : vector<1x256xf32>
    %170 = arith.mulf %169, %159 : vector<1x256xf32>
    %c3_99 = arith.constant 3 : index
    %171 = memref.load %arg1[%c3_99] : memref<35xf32, #tpu.memory_space<smem>>
    %172 = vector.broadcast %171 : f32 to vector<1x256xf32>
    %173 = arith.mulf %170, %172 : vector<1x256xf32>
    %c10 = arith.constant 10 : index
    %174 = memref.load %arg1[%c10] : memref<35xf32, #tpu.memory_space<smem>>
    %175 = vector.broadcast %174 : f32 to vector<1x256xf32>
    %176 = arith.mulf %175, %166 : vector<1x256xf32>
    %c11 = arith.constant 11 : index
    %177 = memref.load %arg1[%c11] : memref<35xf32, #tpu.memory_space<smem>>
    %178 = vector.broadcast %177 : f32 to vector<1x256xf32>
    %179 = arith.mulf %178, %173 : vector<1x256xf32>
    %180 = arith.addf %176, %179 : vector<1x256xf32>
    %c12_100 = arith.constant 12 : index
    %181 = memref.load %arg1[%c12_100] : memref<35xf32, #tpu.memory_space<smem>>
    %182 = vector.broadcast %181 : f32 to vector<1x256xf32>
    %183 = arith.mulf %182, %159 : vector<1x256xf32>
    %184 = arith.addf %180, %183 : vector<1x256xf32>
    %c13 = arith.constant 13 : index
    %185 = memref.load %arg1[%c13] : memref<35xf32, #tpu.memory_space<smem>>
    %186 = vector.broadcast %185 : f32 to vector<1x256xf32>
    %187 = arith.addf %184, %186 : vector<1x256xf32>
    %c14 = arith.constant 14 : index
    %188 = memref.load %arg1[%c14] : memref<35xf32, #tpu.memory_space<smem>>
    %189 = vector.broadcast %188 : f32 to vector<1x256xf32>
    %190 = arith.mulf %189, %166 : vector<1x256xf32>
    %c15_101 = arith.constant 15 : index
    %191 = memref.load %arg1[%c15_101] : memref<35xf32, #tpu.memory_space<smem>>
    %192 = vector.broadcast %191 : f32 to vector<1x256xf32>
    %193 = arith.mulf %192, %173 : vector<1x256xf32>
    %194 = arith.addf %190, %193 : vector<1x256xf32>
    %c16 = arith.constant 16 : index
    %195 = memref.load %arg1[%c16] : memref<35xf32, #tpu.memory_space<smem>>
    %196 = vector.broadcast %195 : f32 to vector<1x256xf32>
    %197 = arith.mulf %196, %159 : vector<1x256xf32>
    %198 = arith.addf %194, %197 : vector<1x256xf32>
    %c17 = arith.constant 17 : index
    %199 = memref.load %arg1[%c17] : memref<35xf32, #tpu.memory_space<smem>>
    %200 = vector.broadcast %199 : f32 to vector<1x256xf32>
    %201 = arith.addf %198, %200 : vector<1x256xf32>
    %c18_102 = arith.constant 18 : index
    %202 = memref.load %arg1[%c18_102] : memref<35xf32, #tpu.memory_space<smem>>
    %203 = vector.broadcast %202 : f32 to vector<1x256xf32>
    %204 = arith.mulf %203, %166 : vector<1x256xf32>
    %c19 = arith.constant 19 : index
    %205 = memref.load %arg1[%c19] : memref<35xf32, #tpu.memory_space<smem>>
    %206 = vector.broadcast %205 : f32 to vector<1x256xf32>
    %207 = arith.mulf %206, %173 : vector<1x256xf32>
    %208 = arith.addf %204, %207 : vector<1x256xf32>
    %c20 = arith.constant 20 : index
    %209 = memref.load %arg1[%c20] : memref<35xf32, #tpu.memory_space<smem>>
    %210 = vector.broadcast %209 : f32 to vector<1x256xf32>
    %211 = arith.mulf %210, %159 : vector<1x256xf32>
    %212 = arith.addf %208, %211 : vector<1x256xf32>
    %c21_103 = arith.constant 21 : index
    %213 = memref.load %arg1[%c21_103] : memref<35xf32, #tpu.memory_space<smem>>
    %214 = vector.broadcast %213 : f32 to vector<1x256xf32>
    %215 = arith.addf %212, %214 : vector<1x256xf32>
    %cst_104 = arith.constant 1.000000e+00 : f32
    %216 = vector.broadcast %cst_104 : f32 to vector<1x256xf32>
    %217 = arith.divf %216, %215 : vector<1x256xf32>
    %c7_105 = arith.constant 7 : index
    %218 = memref.load %arg1[%c7_105] : memref<35xf32, #tpu.memory_space<smem>>
    %219 = vector.broadcast %218 : f32 to vector<1x256xf32>
    %220 = arith.mulf %201, %219 : vector<1x256xf32>
    %221 = arith.mulf %220, %217 : vector<1x256xf32>
    %c9_106 = arith.constant 9 : index
    %222 = memref.load %arg1[%c9_106] : memref<35xf32, #tpu.memory_space<smem>>
    %223 = vector.broadcast %222 : f32 to vector<1x256xf32>
    %224 = arith.addf %221, %223 : vector<1x256xf32>
    %c0_107 = arith.constant 0 : index
    %c0_108 = arith.constant 0 : index
    %225 = vector.load %arg12[%c0_107, %c0_108] : memref<3x256xf32, #tpu.memory_space<vmem>>, vector<1x256xf32>
    tpu.vector_store %arg12[%c0_107, %c0_108], %224 {strides = array<i32>} : memref<3x256xf32, #tpu.memory_space<vmem>>, vector<1x256xf32>,
    %c6_109 = arith.constant 6 : index
    %226 = memref.load %arg1[%c6_109] : memref<35xf32, #tpu.memory_space<smem>>
    %227 = vector.broadcast %226 : f32 to vector<1x256xf32>
    %228 = arith.mulf %187, %227 : vector<1x256xf32>
    %229 = arith.mulf %228, %217 : vector<1x256xf32>
    %c8_110 = arith.constant 8 : index
    %230 = memref.load %arg1[%c8_110] : memref<35xf32, #tpu.memory_space<smem>>
    %231 = vector.broadcast %230 : f32 to vector<1x256xf32>
    %232 = arith.addf %229, %231 : vector<1x256xf32>
    %c1_111 = arith.constant 1 : index
    %c0_112 = arith.constant 0 : index
    %233 = vector.load %arg12[%c1_111, %c0_112] : memref<3x256xf32, #tpu.memory_space<vmem>>, vector<1x256xf32>
    tpu.vector_store %arg12[%c1_111, %c0_112], %232 {strides = array<i32>} : memref<3x256xf32, #tpu.memory_space<vmem>>, vector<1x256xf32>,
    %c2_113 = arith.constant 2 : index
    %c0_114 = arith.constant 0 : index
    %234 = vector.load %arg12[%c2_113, %c0_114] : memref<3x256xf32, #tpu.memory_space<vmem>>, vector<1x256xf32>
    tpu.vector_store %arg12[%c2_113, %c0_114], %215 {strides = array<i32>} : memref<3x256xf32, #tpu.memory_space<vmem>>, vector<1x256xf32>,
    return
  }
  func.func @transform_0(%arg0: i32) -> i32 {
    %c0_i32 = arith.constant 0 : i32
    %c0_i32_0 = arith.constant 0 : i32
    return %c0_i32 : i32
  }
  func.func @transform_1(%arg0: i32) -> (i32, i32) {
    %c0_i32 = arith.constant 0 : i32
    %c0_i32_0 = arith.constant 0 : i32
    return %c0_i32, %arg0 : i32, i32
  }
  func.func @transform_2(%arg0: i32) -> (i32, i32) {
    %c0_i32 = arith.constant 0 : i32
    %c0_i32_0 = arith.constant 0 : i32
    return %c0_i32, %arg0 : i32, i32
  }
  func.func @transform_3(%arg0: i32) -> (i32, i32) {
    %c0_i32 = arith.constant 0 : i32
    %c0_i32_0 = arith.constant 0 : i32
    return %c0_i32, %arg0 : i32, i32
  }
  func.func @transform_4(%arg0: i32) -> (i32, i32) {
    %c0_i32 = arith.constant 0 : i32
    %c0_i32_0 = arith.constant 0 : i32
    return %c0_i32, %arg0 : i32, i32
  }
  func.func @transform_5(%arg0: i32) -> (i32, i32) {
    %c0_i32 = arith.constant 0 : i32
    %c0_i32_0 = arith.constant 0 : i32
    %c0_i32_1 = arith.constant 0 : i32
    return %c0_i32, %c0_i32_0 : i32, i32
  }
  func.func @transform_6(%arg0: i32) -> (i32, i32) {
    %c0_i32 = arith.constant 0 : i32
    %c0_i32_0 = arith.constant 0 : i32
    %c0_i32_1 = arith.constant 0 : i32
    return %c0_i32, %c0_i32_0 : i32, i32
  }
  func.func @transform_7(%arg0: i32) -> (i32, i32, i32) {
    %c0_i32 = arith.constant 0 : i32
    %c0_i32_0 = arith.constant 0 : i32
    %c0_i32_1 = arith.constant 0 : i32
    %c0_i32_2 = arith.constant 0 : i32
    return %c0_i32, %c0_i32_0, %c0_i32_1 : i32, i32, i32
  }
  func.func @transform_8(%arg0: i32) -> (i32, i32, i32) {
    %c0_i32 = arith.constant 0 : i32
    %c0_i32_0 = arith.constant 0 : i32
    %c0_i32_1 = arith.constant 0 : i32
    %c0_i32_2 = arith.constant 0 : i32
    return %c0_i32, %c0_i32_0, %c0_i32_1 : i32, i32, i32
  }
  func.func @transform_9(%arg0: i32) -> (i32, i32) {
    %c0_i32 = arith.constant 0 : i32
    %c0_i32_0 = arith.constant 0 : i32
    %c0_i32_1 = arith.constant 0 : i32
    return %c0_i32, %c0_i32_0 : i32, i32
  }
  func.func @transform_10(%arg0: i32) -> (i32, i32) {
    %c0_i32 = arith.constant 0 : i32
    %c0_i32_0 = arith.constant 0 : i32
    %c0_i32_1 = arith.constant 0 : i32
    return %c0_i32, %c0_i32_0 : i32, i32
  }
  func.func @transform_11(%arg0: i32) -> (i32, i32) {
    %c0_i32 = arith.constant 0 : i32
    %c0_i32_0 = arith.constant 0 : i32
    return %c0_i32, %arg0 : i32, i32
  }
}

</mosaic_0001>

<bundles_post_ra>
// kernel: custom-call.11
= control target key start
LH: loop header
LB: loop body
LE: loop exit
PB: predicated region body
PF: predicated region fallthrough
CT: control target
= control target key end

     0   :  { %5 = vsyncpa [#allocation6], 0  ;;  %v75_v1 = vlaneseq  ;;  %v526_v2 = vmov 0   ;;  %s555_s14 = smov 0   ;;  %s605_s0 = inlined_call_operand.vmem [shape: f32[4,4], index: 0, kind: input, shape index: {}]   ;;  %s606_s1 = inlined_call_operand.vmem [shape: f32[4,4], index: 1, kind: output, shape index: {0}]   ;;  %s607_s2 = inlined_call_operand.hbm [shape: s32[4], index: 2, kind: output, shape index: {1}]   ;;  %s608_s3 = inlined_call_operand.vmem [shape: s32[4], index: 3, kind: output, shape index: {2}]  }
   0x1   :  { %v66_v0 = vld [vmem:[%s605_s0] sm:$0xf]  ;;  %74 = vst [vmem:[#allocation4] sm:$0x1] %v526_v2 }
   0x2   :  { %67 = vst [vmem:[#allocation1] sm:$0xf] %v66_v0  ;;  %v552_v3 = vshrl.u32 %v75_v1, 7 }
   0x4   :  { %79 = vst [vmem:[#allocation9] sm:$0xff] %v552_v3 }
   0x9   :  { %v70_v4 = vld [vmem:[#allocation1] sm:$0xf] }
   0xa   :  { %71 = vst [vmem:[#allocation0] sm:$0xf] %v70_v4 }
  0x11   :  { %v72_v5 = vld [vmem:[#allocation0] sm:$0xff] }
  0x12   :  { %73 = vst [vmem:[#allocation2] sm:$0xff] %v72_v5 }
  0x13 LB: > { %vm95_vm0 = vcmp.lt.s32.totalorder %v552_v3, 4  ;;  %v562_v8 = vstv %s524_s14  ;;  %s136_s0 = ssub.s32 128, %s524_s14  ;;  %v142_v38 = vand.u32 127, %v75_v1  ;;  %v145_v40 = vld [vmem:[#allocation4] ss:$0 sm:$0xff]  ;;  %s148_s15 = scalar_lea.vmem [#allocation2], %s524_s14  ;;  %s524_s14 = sphi %s555_s14, %s85_s14  }
  0x14   : > { %vm94_vm1 = vcmp.ge.s32.totalorder %v552_v3, %v562_v8  ;;  %s154_s17 = scalar_lea.vmem [#allocation9], %s524_s14  ;;  %vm174_vm15 = vcmp.gt.s32.totalorder %v552_v3, %v562_v8  ;;  %s85_s14 = sadd.s32 1, %s524_s14  }
  0x15   : > { %vm96_vm3 = vmand %vm94_vm1, %vm95_vm0  ;;  %vm166_vm12 = vcmp.gt.s32.totalorder %v142_v38, %v562_v8  ;;  %vm143_vm13 = vcmp.eq.s32.totalorder %v142_v38, %v562_v8  ;;  %v156_v42 = vld [vmem:[%s154_s17] ss:$0 sm:$0xff]  ;;  %p82_p0 = scmp.ge.s32.totalorder %s85_s14, 4  }
  0x16   : > { %vm178_vm1 = vmand %vm174_vm15, %vm143_vm13  ;;  %s527_s20 = smov (%p82_p0), [#allocation5]  }
  0x17   :  { %s319_s21 = sshll.u32 (%p82_p0), %s527_s20, 4  ;;  %s320_s21 = int_to_ptr.vmem [resolvable:$true] %s319_s21 }
  0x18   :  { %s494_s24 = scalar_lea.vmem (%p82_p0), %s320_s21, 16  ;;  %s498_s25 = scalar_lea.vmem (%p82_p0), %s320_s21, 32 }
  0x19   : > { %v90_v6 = vld [vmem:[#allocation2] sm:$0xff]  ;;  %v150_v41 = vld [vmem:[%s148_s15] ss:$0 sm:$0xff]  ;;  %p495_p1 = scmp.ne.s32.totalorder (%p82_p0), %s320_s21, %s494_s24  ;;  %p499_p2 = scmp.lt.s32.totalorder (%p82_p0), %s320_s21, %s320_s21 }
  0x1a   : > { %v91_v7 = vand.u32 2147483647, %v90_v6  ;;  %p500_p3 = scmp.lt.s32.totalorder (%p82_p0), %s498_s25, %s494_s24 }
  0x1c   : > { %vm473_vm2 = vcmp.gt.f32.partialorder %v91_v7, -inf  ;;  %p501_p4 = por (%p82_p0), %p500_p3, %p499_p2 }
  0x1d   : > { %vm98_vm4 = vmand %vm96_vm3, %vm473_vm2 }
  0x1e   : > { %v99_v9 = vsel %vm98_vm4, %v552_v3, %v562_v8  ;;  %v100_v10 = vsel %vm98_vm4, %v91_v7, -inf  ;;  %p502_p5 = pnand (%p82_p0), %p501_p4, %p495_p1 }
  0x1f   : > { %v101_v11 = vrot.slane %v100_v10, 1  ;;  %v102_v12 = vrot.slane %v99_v9, 1 }
  0x21   : > { %vm103_vm5 = vcmp.ge.f32.partialorder %v101_v11, %v100_v10  ;;  %v106_v13 = vrot.slane %v101_v11, 1  ;;  %v107_v14 = vrot.slane %v102_v12, 1 }
  0x22   : > { %v104_v15 = vsel %vm103_vm5, %v101_v11, %v100_v10  ;;  %v105_v16 = vsel %vm103_vm5, %v102_v12, %v99_v9 }
  0x23   : > { %vm108_vm6 = vcmp.ge.f32.partialorder %v106_v13, %v104_v15  ;;  %v111_v17 = vrot.slane %v106_v13, 1  ;;  %v112_v18 = vrot.slane %v107_v14, 1 }
  0x24   : > { %v109_v19 = vsel %vm108_vm6, %v106_v13, %v104_v15  ;;  %v110_v20 = vsel %vm108_vm6, %v107_v14, %v105_v16 }
  0x25   : > { %vm113_vm7 = vcmp.ge.f32.partialorder %v111_v17, %v109_v19  ;;  %v116_v21 = vrot.slane %v111_v17, 1  ;;  %v117_v22 = vrot.slane %v112_v18, 1 }
  0x26   : > { %v114_v23 = vsel %vm113_vm7, %v111_v17, %v109_v19  ;;  %v115_v24 = vsel %vm113_vm7, %v112_v18, %v110_v20 }
  0x27   : > { %vm118_vm8 = vcmp.ge.f32.partialorder %v116_v21, %v114_v23  ;;  %v121_v25 = vrot.slane %v116_v21, 1  ;;  %v122_v26 = vrot.slane %v117_v22, 1 }
  0x28   : > { %v119_v27 = vsel %vm118_vm8, %v116_v21, %v114_v23  ;;  %v120_v28 = vsel %vm118_vm8, %v117_v22, %v115_v24 }
  0x29   : > { %vm123_vm9 = vcmp.ge.f32.partialorder %v121_v25, %v119_v27  ;;  %v126_v29 = vrot.slane %v121_v25, 1  ;;  %v127_v30 = vrot.slane %v122_v26, 1 }
  0x2a   : > { %v124_v31 = vsel %vm123_vm9, %v121_v25, %v119_v27  ;;  %v125_v32 = vsel %vm123_vm9, %v122_v26, %v120_v28 }
  0x2b   : > { %vm128_vm10 = vcmp.ge.f32.partialorder %v126_v29, %v124_v31  ;;  %v131_v33 = vrot.slane %v126_v29, 1  ;;  %v132_v34 = vrot.slane %v127_v30, 1 }
  0x2c   : > { %v129_v35 = vsel %vm128_vm10, %v126_v29, %v124_v31  ;;  %v130_v36 = vsel %vm128_vm10, %v127_v30, %v125_v32 }
  0x2d   : > { %vm133_vm11 = vcmp.ge.f32.partialorder %v131_v33, %v129_v35 }
  0x2e   : > { %v135_v37 = vsel %vm133_vm11, %v132_v34, %v130_v36 }
  0x2f   : > { %137 = vrot.lane.b32.xlu0 %v135_v37, %s136_s0 }
  0xa1   : > { %v138_v39 = vpop.permute.xlu0 %137 }
  0xa2   : > { %480 = vpush %v138_v39 }
  0xd3   : > { %s481_s16 = spop %480 }
  0xd4   : > { %v144_v43 = vstv %s481_s16  ;;  %s149_s18 = scalar_lea.vmem [#allocation2], %s481_s16  ;;  %s155_s19 = scalar_lea.vmem [#allocation9], %s481_s16 }
  0xd5   : > { %v151_v44 = vld [vmem:[%s149_s18] ss:$0 sm:$0xff]  ;;  %v146_v46 = vsel %vm143_vm13, %v144_v43, %v145_v40 }
  0xd6   : > { %v157_v45 = vld [vmem:[%s155_s19] ss:$0 sm:$0xff]  ;;  %152 = vst [vmem:[%s149_s18] sm:$0x1] %v150_v41  ;;  %vm160_vm14 = vcmp.ne.f32.partialorder %v151_v44, 0.0  ;;  %147 = vst [vmem:[#allocation4] sm:$0x1] %v146_v46 }
  0xd7   : > { %158 = vst [vmem:[%s155_s19] sm:$0x1] %v156_v42  ;;  %153 = vst [vmem:[%s148_s15] sm:$0x1] %v151_v44  ;;  %v167_v53 = vsel %vm166_vm12, %v151_v44, 0.0 }
  0xd8   : > { %159 = vst [vmem:[%s154_s17] sm:$0x1] %v157_v45  ;;  %vm161_vm0 = vmand %vm143_vm13, %vm160_vm14 }
  0xd9   : > { %v162_v47 = vsel %vm161_vm0, %v151_v44, 1.0 }
  0xda   : > { %v175_v48 = vsel %vm174_vm15, %v162_v47, 1.0 }
  0xdb   : > { %492 = vrcp.f32 %v175_v48 }
  0xdd   :  { %v243_v59 = vld [vmem:[#allocation4] sm:$0x1] (%p82_p0) }
  0xde   : > { %v171_v50 = vld [vmem:[#allocation2] sm:$0xff]  ;;  %245 = vst [vmem:[#allocation5] sm:$0x1] (%p82_p0), %v243_v59 }
  0xdf   :  { %v185_v57 = vld [vmem:[#allocation9] sm:$0xff] (%p82_p0) }
  0xe5   : > { %v493_v49 = vpop.eup %492 }
  0xe6   : > { %v177_v51 = vmul.f32 %v493_v49, %v171_v50 }
  0xe8   : > { %v179_v52 = vsel %vm178_vm1, %v177_v51, 0.0 }
  0xe9   : > { %180 = vadd.xlane.f32.xlu0 %v179_v52 }
 0x116   :  { %201 = vxpose.xlu0.b32.start.end [1/1] (short) (narrow) (%p82_p0), %v185_v57, 8 }
 0x175   :  { %84 = sbr.rel (!%p82_p0) target bundleno = 19 (0x13), region = 163 }
 0x176   : > { %v181_v54 = vpop.xlane.xlu0 %180 }
 0x177   : > { %v182_v55 = vmul.f32 %v181_v54, %v167_v53 }
 0x179   : > { %v183_v56 = vsub.f32 %v177_v51, %v182_v55 }
 0x17b   : > { %184 = vst [vmem:[#allocation2] sm:$0xff] %v183_v56 }
 0x182   :  { %v237_v58 = vld [vmem:[#allocation2] sm:$0xf] }
 0x183   :  { %239 = vst [vmem:[#allocation3] sm:$0xf] %v237_v58 }
 0x18a   :  { %v312_v60 = vld [vmem:[#allocation3] sm:$0xf] }
 0x18b   :  { %313 = vst [vmem:[%s606_s1] sm:$0xf] %v312_v60 }
 0x18c   :  { %505 = shalt.err (!%p502_p5)
}
 0x18d   :  { %s506_s28 = scalar_lea.hbm %s607_s2, 16 }
 0x18e   :  { %p507_p6 = scmp.ne.s32.totalorder %s607_s2, %s506_s28  ;;  %p510_p7 = scmp.lt.u32.totalorder %s506_s28, %s607_s2 }
 0x190   :  { %p512_p8 = pnand %p510_p7, %p507_p6 }
 0x192   :  { %515 = shalt.err (!%p512_p8)
}
 0x193   :  { %322 = dma.vmem_to_hbm [thread:$0]  %s320_s21, 16, %s607_s2, [#allocation6]  }
 0x196   :  { %v217_v61 = vpop.trf.xlu0 }
 0x197   :  { %233 = vst [vmem:[#allocation7] sm:$0x1] %v217_v61 }
 0x19e   :  { %v249_v62 = vld [vmem:[#allocation7] sm:$0x1] }
 0x19f   :  { %251 = vst [vmem:[#allocation8] sm:$0x1] %v249_v62 }
 0x1a6   :  { %v385_v63 = vld [vmem:[#allocation8] sm:$0x1] }
 0x1a7   :  { %386 = vst [vmem:[%s608_s3] sm:$0x1] %v385_v63 }
 0x1a8   :  { %520 = dma.done.wait [#allocation6], 16  }
 0x1a9   :  { %521 = vsyncadd [#allocation6], 4294967280 }
 0x1aa   :  { %392 = vsyncpa [#allocation6], 1 }

// kernel: custom-call.13
= control target key start
LH: loop header
LB: loop body
LE: loop exit
PB: predicated region body
PF: predicated region fallthrough
CT: control target
= control target key end

     0   :  { %v37_v1 = vlaneseq  ;;  %v148_v11 = vmov -1.0   ;;  %s165_s0 = inlined_call_operand.vmem [shape: f32[1,4,4], index: 0, kind: input, shape index: {}]   ;;  %s166_s1 = inlined_call_operand.vmem [shape: f32[1,4,4], index: 1, kind: output, shape index: {}]  }
   0x1   :  { %v17_v0 = vld [vmem:[%s165_s0] sm:$0xf] }
   0x2   :  { %18 = vst [vmem:[#allocation1] sm:$0xf] %v17_v0  ;;  %v38_v3 = vand.u32 127, %v37_v1  ;;  %v41_v4 = vshrl.u32 %v37_v1, 7 }
   0x4   :  { %vm39_vm0 = vcmp.lt.s32.totalorder %v38_v3, 4  ;;  %vm48_vm1 = vcmp.ge.s32.totalorder %v41_v4, %v38_v3  ;;  %vm43_vm2 = vcmp.eq.s32.totalorder %v41_v4, %v38_v3  ;;  %vm62_vm4 = vcmp.eq.s32.totalorder %v38_v3, 0 }
   0x5   :  { %vm49_vm3 = vmand %vm48_vm1, %vm39_vm0  ;;  %vm59_vm5 = vcmp.eq.s32.totalorder %v38_v3, %v41_v4  ;;  %v63_v12 = vsel %vm62_vm4, 1.0, %v148_v11  ;;  %vm70_vm6 = vcmp.eq.s32.totalorder %v38_v3, 1  ;;  %vm80_vm7 = vcmp.eq.s32.totalorder %v38_v3, 2 }
   0x6   :  { %v64_v13 = vsel %vm59_vm5, %v63_v12, 0.0  ;;  %vm90_vm8 = vcmp.eq.s32.totalorder %v38_v3, 3 }
   0x9   :  { %v35_v2 = vld [vmem:[#allocation1] sm:$0xf] }
   0xa   :  { %36 = vst [vmem:[#allocation0] sm:$0xf] %v35_v2 }
  0x11   :  { %v44_v5 = vld [vmem:[#allocation0] sm:$0xff] }
  0x12   :  { %v45_v6 = vsel %vm43_vm2, %v44_v5, 0.0  ;;  %v50_v7 = vsel %vm49_vm3, %v44_v5, 0.0 }
  0x13   :  { %46 = vadd.xlane.f32.xlu0 %v45_v6 }
  0xa0   :  { %v47_v8 = vpop.xlane.xlu0 %46 }
  0xa1   :  { %146 = vrcp.f32 %v47_v8  ;;  %vm97_vm9 = vweird.f32 %v47_v8 }
  0xab   :  { %v147_v9 = vpop.eup %146 }
  0xac   :  { %v52_v10 = vmul.f32 %v147_v9, %v50_v7 }
  0xae   :  { %53 = vst [vmem:[#allocation4] sm:$0xff] %v52_v10 }
  0xb5   :  { %v66_v14 = vld [vmem:[#allocation4 + $0x1] ss:$0 sm:$0xff]  ;;  %v76_v17 = vld [vmem:[#allocation4 + $0x2] ss:$0 sm:$0xff]  ;;  %v86_v22 = vld [vmem:[#allocation4 + $0x3] ss:$0 sm:$0xff] }
  0xb6   :  { %v67_v15 = vxor.u32 2147483648, %v66_v14  ;;  %v77_v19 = vxor.u32 2147483648, %v76_v17  ;;  %v87_v24 = vxor.u32 2147483648, %v86_v22 }
  0xb8   :  { %v71_v16 = vmul.f32 %v67_v15, %v64_v13 }
  0xba   :  { %72 = vadd.xlane.f32.xlu0 %v71_v16 }
 0x147   :  { %v73_v18 = vpop.xlane.xlu0 %72 }
 0x148   :  { %v74_v20 = vsel %vm70_vm6, %v73_v18, %v64_v13 }
 0x149   :  { %v81_v21 = vmul.f32 %v77_v19, %v74_v20 }
 0x14b   :  { %82 = vadd.xlane.f32.xlu1 %v81_v21 }
 0x1d8   :  { %v83_v23 = vpop.xlane.xlu1 %82 }
 0x1d9   :  { %v84_v25 = vsel %vm80_vm7, %v83_v23, %v74_v20 }
 0x1da   :  { %v91_v26 = vmul.f32 %v87_v24, %v84_v25 }
 0x1dc   :  { %92 = vadd.xlane.f32.xlu1 %v91_v26 }
 0x269   :  { %v93_v27 = vpop.xlane.xlu1 %92 }
 0x26a   :  { %v94_v28 = vsel %vm90_vm8, %v93_v27, %v84_v25 }
 0x26b   :  { %v96_v29 = vmul.f32 %v147_v9, %v94_v28 }
 0x26d   :  { %v98_v30 = vsel %vm97_vm9, %v94_v28, %v96_v29 }
 0x26e   :  { %99 = vst [vmem:[#allocation2] sm:$0xff] %v98_v30 }
 0x275   :  { %v103_v31 = vld [vmem:[#allocation2] sm:$0xf] }
 0x276   :  { %105 = vst [vmem:[#allocation3] sm:$0xf] %v103_v31 }
 0x27d   :  { %v121_v32 = vld [vmem:[#allocation3] sm:$0xf] }
 0x27e   :  { %122 = vst [vmem:[%s166_s1] sm:$0xf] %v121_v32 }

// kernel: custom-call.12
= control target key start
LH: loop header
LB: loop body
LE: loop exit
PB: predicated region body
PF: predicated region fallthrough
CT: control target
= control target key end

     0   :  { %v37_v1 = vlaneseq  ;;  %v147_v11 = vmov -1.0   ;;  %s164_s0 = inlined_call_operand.vmem [shape: f32[1,4,4], index: 0, kind: input, shape index: {}]   ;;  %s165_s1 = inlined_call_operand.vmem [shape: f32[1,4,4], index: 1, kind: output, shape index: {}]  }
   0x1   :  { %v17_v0 = vld [vmem:[%s164_s0] sm:$0xf] }
   0x2   :  { %18 = vst [vmem:[#allocation1] sm:$0xf] %v17_v0  ;;  %v38_v3 = vand.u32 127, %v37_v1  ;;  %v41_v4 = vshrl.u32 %v37_v1, 7 }
   0x4   :  { %vm39_vm0 = vcmp.lt.s32.totalorder %v38_v3, 4  ;;  %vm48_vm1 = vcmp.le.s32.totalorder %v41_v4, %v38_v3  ;;  %vm43_vm2 = vcmp.eq.s32.totalorder %v41_v4, %v38_v3  ;;  %vm62_vm4 = vcmp.eq.s32.totalorder %v38_v3, 3 }
   0x5   :  { %vm49_vm3 = vmand %vm48_vm1, %vm39_vm0  ;;  %vm59_vm5 = vcmp.eq.s32.totalorder %v38_v3, %v41_v4  ;;  %v63_v12 = vsel %vm62_vm4, 1.0, %v147_v11  ;;  %vm70_vm6 = vcmp.eq.s32.totalorder %v38_v3, 2  ;;  %vm80_vm7 = vcmp.eq.s32.totalorder %v38_v3, 1 }
   0x6   :  { %v64_v13 = vsel %vm59_vm5, %v63_v12, 0.0  ;;  %vm89_vm8 = vcmp.eq.s32.totalorder %v38_v3, 0 }
   0x9   :  { %v35_v2 = vld [vmem:[#allocation1] sm:$0xf] }
   0xa   :  { %36 = vst [vmem:[#allocation0] sm:$0xf] %v35_v2 }
  0x11   :  { %v44_v5 = vld [vmem:[#allocation0] sm:$0xff] }
  0x12   :  { %v45_v6 = vsel %vm43_vm2, %v44_v5, 0.0  ;;  %v50_v7 = vsel %vm49_vm3, %v44_v5, 0.0 }
  0x13   :  { %46 = vadd.xlane.f32.xlu0 %v45_v6 }
  0xa0   :  { %v47_v8 = vpop.xlane.xlu0 %46 }
  0xa1   :  { %145 = vrcp.f32 %v47_v8  ;;  %vm96_vm9 = vweird.f32 %v47_v8 }
  0xab   :  { %v146_v9 = vpop.eup %145 }
  0xac   :  { %v52_v10 = vmul.f32 %v146_v9, %v50_v7 }
  0xae   :  { %53 = vst [vmem:[#allocation4] sm:$0xff] %v52_v10 }
  0xb5   :  { %v66_v14 = vld [vmem:[#allocation4 + $0x2] ss:$0 sm:$0xff]  ;;  %v76_v17 = vld [vmem:[#allocation4 + $0x1] ss:$0 sm:$0xff]  ;;  %v85_v22 = vld [vmem:[#allocation4] ss:$0 sm:$0xff] }
  0xb6   :  { %v67_v15 = vxor.u32 2147483648, %v66_v14  ;;  %v77_v19 = vxor.u32 2147483648, %v76_v17  ;;  %v86_v24 = vxor.u32 2147483648, %v85_v22 }
  0xb8   :  { %v71_v16 = vmul.f32 %v67_v15, %v64_v13 }
  0xba   :  { %72 = vadd.xlane.f32.xlu0 %v71_v16 }
 0x147   :  { %v73_v18 = vpop.xlane.xlu0 %72 }
 0x148   :  { %v74_v20 = vsel %vm70_vm6, %v73_v18, %v64_v13 }
 0x149   :  { %v81_v21 = vmul.f32 %v77_v19, %v74_v20 }
 0x14b   :  { %82 = vadd.xlane.f32.xlu1 %v81_v21 }
 0x1d8   :  { %v83_v23 = vpop.xlane.xlu1 %82 }
 0x1d9   :  { %v84_v25 = vsel %vm80_vm7, %v83_v23, %v74_v20 }
 0x1da   :  { %v90_v26 = vmul.f32 %v86_v24, %v84_v25 }
 0x1dc   :  { %91 = vadd.xlane.f32.xlu1 %v90_v26 }
 0x269   :  { %v92_v27 = vpop.xlane.xlu1 %91 }
 0x26a   :  { %v93_v28 = vsel %vm89_vm8, %v92_v27, %v84_v25 }
 0x26b   :  { %v95_v29 = vmul.f32 %v146_v9, %v93_v28 }
 0x26d   :  { %v97_v30 = vsel %vm96_vm9, %v93_v28, %v95_v29 }
 0x26e   :  { %98 = vst [vmem:[#allocation2] sm:$0xff] %v97_v30 }
 0x275   :  { %v102_v31 = vld [vmem:[#allocation2] sm:$0xf] }
 0x276   :  { %104 = vst [vmem:[#allocation3] sm:$0xf] %v102_v31 }
 0x27d   :  { %v120_v32 = vld [vmem:[#allocation3] sm:$0xf] }
 0x27e   :  { %121 = vst [vmem:[%s165_s1] sm:$0xf] %v120_v32 }

// kernel: bundle_forward.1
= control target key start
LH: loop header
LB: loop body
LE: loop exit
PB: predicated region body
PF: predicated region fallthrough
CT: control target
= control target key end

     0   :  { %s1673_s0 = inlined_call_operand.vmem [shape: f32[35], index: 0, kind: input, shape index: {}]   ;;  %s1674_s1 = inlined_call_operand.vmem [shape: f32[3,256], index: 1, kind: input, shape index: {}]   ;;  %s1675_s2 = inlined_call_operand.vmem [shape: f32[2,256], index: 2, kind: input, shape index: {}]   ;;  %s1676_s3 = inlined_call_operand.vmem [shape: f32[3,256], index: 3, kind: input, shape index: {}]   ;;  %s1677_s4 = inlined_call_operand.vmem [shape: f32[9,256], index: 4, kind: input, shape index: {}]   ;;  %s1678_s5 = inlined_call_operand.vmem [shape: bf16[32,48], index: 5, kind: input, shape index: {}]   ;;  %s1679_s6 = inlined_call_operand.vmem [shape: f32[32,1], index: 6, kind: input, shape index: {}]   ;;  %s1680_s7 = inlined_call_operand.vmem [shape: bf16[2,32,32], index: 7, kind: input, shape index: {}]   ;;  %s1681_s8 = inlined_call_operand.vmem [shape: f32[2,32,1], index: 8, kind: input, shape index: {}]   ;;  %s1682_s9 = inlined_call_operand.vmem [shape: bf16[1,32], index: 9, kind: input, shape index: {}]   ;;  %s1683_s10 = inlined_call_operand.<no memory space> [shape: f32[1,1], index: 10, kind: input, shape index: {}]   ;;  %s1684_s11 = inlined_call_operand.vmem [shape: f32[3,256], index: 11, kind: output, shape index: {}]  }
   0x1   :  { %v16_v0 = vstv %s1683_s10 }
   0x2   :  { %17 = vst [vmem:[#allocation3] sm:$0x1] %v16_v0 }
   0x3   :  { %18 = vsyncpa [#allocation5], 0  ;;  %s25_s21 = sshll.u32 %s1673_s0, 4  ;;  %s26_s21 = int_to_ptr.vmem [resolvable:$true] %s25_s21 }
   0x4   :  { %s1326_s22 = scalar_lea.vmem %s26_s21, 16  ;;  %p1331_p1 = scmp.lt.s32.totalorder %s26_s21, %s26_s21 }
   0x5   :  { %p1327_p0 = scmp.ne.s32.totalorder %s26_s21, %s1326_s22  ;;  %p1332_p2 = scmp.lt.s32.totalorder %s1326_s22, %s1326_s22 }
   0x7   :  { %p1333_p3 = por %p1332_p2, %p1331_p1 }
   0x9   :  { %p1334_p4 = pnand %p1333_p3, %p1327_p0 }
   0xb   :  { %1337 = shalt.err (!%p1334_p4)
}
   0xc   :  { %s1340_s23 = smov [#allocation4]  }
   0xd   :  { %28 = dma.vmem_to_smem %s26_s21, 16, %s1340_s23, [#allocation5]  }
   0xe   :  { %1338 = dma.done.wait [#allocation5], 16  }
   0xf   :  { %1339 = vsyncadd [#allocation5], 4294967280 }
  0x10   :  { %52 = sfence }
  0x11   :  { %v54_v1 = vld [vmem:[%s1674_s1] ss:$4 sm:$0x3]  ;;  %v64_v2 = vlaneseq  ;;  %v1207_v3 = vld [vmem:[%s1674_s1 + $0x1] ss:$4 sm:$0x3] }
  0x12   :  { %v1425_v4 = vld [vmem:[%s1674_s1 + $0x2] ss:$4 sm:$0x3]  ;;  %s61_s30 = sld [smem:[#allocation4]]  ;;  %s1210_s14 = sld [smem:[#allocation4 + $0x1]]  ;;  %v1341_v12 = vmov 0.0  }
  0x13   :  { %v59_v5 = vld [vmem:[%s1675_s2] ss:$2 sm:$0x3]  ;;  %vm1431_vm0 = vcmp.lt.s32.totalorder %v64_v2, 256  ;;  %646 = vst [vmem:[#allocation2 + $0x58] sm:$0xfc] %v1341_v12 }
  0x14   :  { %v1209_v7 = vld [vmem:[%s1675_s2 + $0x1] ss:$2 sm:$0x3]  ;;  %80 = vst.msk [vmem:[#allocation2 + $0x2] ss:$8 sm:$0x3] %vm1431_vm0, %v1425_v4  ;;  %v60_v8 = vadd.f32 %v59_v5, %v54_v1 }
  0x15   :  { %v634_v9 = vld [vmem:[%s1676_s3] sm:$0x77]  ;;  %v72_v10 = vadd.f32 %v1209_v7, %v1207_v3  ;;  %645 = vst [vmem:[#allocation2 + $0x50] sm:$0xfc] %v1341_v12  ;;  %v1342_v19 = vmov 0   ;;  %v671_v37 = vld [vmem:[%s1679_s6 + $0x10] sm:$0xff] }
  0x16   :  { %v636_v11 = vcombine.high %v634_v9, %v634_v9  ;;  %v637_v13 = vrot.slane %v634_v9, 1  ;;  %742 = vmatprep.mubr.bf16.mxu0 %v1342_v19  ;;  %1305 = vset.pattern.permute.xlu0 %v1342_v19  ;;  %v669_v36 = vld [vmem:[%s1679_s6] sm:$0xff]  ;;  %v670_v42 = vld [vmem:[%s1679_s6 + $0x8] sm:$0xff]  ;;  %v672_v43 = vld [vmem:[%s1679_s6 + $0x18] sm:$0xff]  ;;  %v1343_v48 = vmov 683565275  }
  0x17   :  { %1306 = vset.pattern.permute.xlu1 %v1342_v19  ;;  %852 = vmatprep.mubr.bf16.mxu1 %v1342_v19  ;;  %v1344_v50 = vmov 2475754826   ;;  %v1345_v52 = vmov 2131351028   ;;  %v1346_v54 = vmov 2102212464  }
  0x18   :  { %v62_v14 = vstv %s61_s30  ;;  %v638_v15 = vrot.slane %v636_v11, 1  ;;  %641 = vst [vmem:[#allocation2 + $0x50] ss:$-12 sps:$4 sm:$0x83] %v637_v13   ;;  %v74_v17 = vstv %s1210_s14  ;;  %675 = vperm.xlu0 %1305, %v669_v36   ;;  %685 = vperm.xlu1 %1306, %v671_v37   ;;  %v1347_v56 = vmov 920167782  }
  0x19   :  { %v63_v16 = vmul.f32 %v62_v14, %v60_v8  ;;  %v75_v18 = vmul.f32 %v74_v17, %v72_v10  ;;  %v779_v63 = vld [vmem:[%s1681_s8] sm:$0xff]  ;;  %v1348_v1 = vmov 1326507024   ;;  %v780_v5 = vld [vmem:[%s1681_s8 + $0x8] sm:$0xff]  ;;  %s1248_s24 = sld [smem:[#allocation4 + $0x1a]]  ;;  %s1249_s25 = sld [smem:[#allocation4 + $0x1b]] }
  0x1a   :  { %642 = vst [vmem:[#allocation2 + $0x58] ss:$-12 sps:$4 sm:$0x83] %v638_v15   ;;  %s1251_s0 = sld [smem:[#allocation4 + $0x1c]]  ;;  %s1253_s26 = sld [smem:[#allocation4 + $0x1d]] }
  0x1b   :  { %68 = vst.msk [vmem:[#allocation2] ss:$8 sm:$0x3] %vm1431_vm0, %v63_v16  ;;  %77 = vst.msk [vmem:[#allocation2 + $0x1] ss:$8 sm:$0x3] %vm1431_vm0, %v75_v18 }
  0x1c   :  { %680 = vperm.xlu0 %1305, %v670_v42   ;;  %690 = vperm.xlu1 %1306, %v672_v43   ;;  %v781_v18 = vld [vmem:[%s1681_s8 + $0x10] sm:$0xff]  ;;  %v1239_v42 = vld [vmem:[%s1681_s8 + $0x20] sm:$0xff]  ;;  %s1255_s13 = sld [smem:[#allocation4 + $0x1e]]  ;;  %s1257_s16 = sld [smem:[#allocation4 + $0x1f]] }
  0x1d   :  { %s1259_s3 = sld [smem:[#allocation4 + $0x20]]  ;;  %s1261_s18 = sld [smem:[#allocation4 + $0x21]] }
  0x1e   :  { %s1263_s21 = sld [smem:[#allocation4 + $0x22]]  ;;  %s1265_s10 = sld [smem:[#allocation4 + $0x4]] }
  0x1f   :  { %s1277_s27 = sld [smem:[#allocation4 + $0x12]]  ;;  %s1278_s28 = sld [smem:[#allocation4 + $0x13]] }
  0x20   :  { %785 = vperm.xlu0 %1305, %v779_v63   ;;  %790 = vperm.xlu1 %1306, %v780_v5   ;;  %s1273_s29 = sld [smem:[#allocation4 + $0xe]]  ;;  %s1274_s30 = sld [smem:[#allocation4 + $0xf]] }
  0x21   :  { %s1279_s15 = sld [smem:[#allocation4 + $0x14]]  ;;  %s1275_s2 = sld [smem:[#allocation4 + $0x10]] }
  0x22   :  { %v1450_v20 = vld [vmem:[#allocation2 + $0x8] sm:$0x7]  ;;  %v1452_v21 = vld [vmem:[#allocation2] sm:$0x7]  ;;  %s1281_s17 = sld [smem:[#allocation4 + $0x7]]  ;;  %s1282_s20 = sld [smem:[#allocation4 + $0x9]] }
  0x23   :  { %v188_v22 = vand.u32 2147483647, %v1450_v20  ;;  %v191_v23 = vand.u32 2139095040, %v1450_v20  ;;  %v84_v24 = vand.u32 2147483647, %v1452_v21  ;;  %v87_v25 = vand.u32 2139095040, %v1452_v21 }
  0x24   :  { %795 = vperm.xlu0 %1305, %v781_v18   ;;  %vm190_vm15 = vcmp.lt.s32.totalorder %v1450_v20, 0 }
  0x25   :  { %v192_v26 = vshrl.u32 %v191_v23, 23  ;;  %v195_v27 = vand.u32 8388607, %v188_v22  ;;  %v88_v28 = vshrl.u32 %v87_v25, 23  ;;  %v91_v29 = vand.u32 8388607, %v84_v24 }
  0x27   :  { %v1215_v30 = vadd.s32 4294967169, %v192_v26  ;;  %v1211_v31 = vadd.s32 4294967169, %v88_v28  ;;  %v196_v33 = vor.u32 8388608, %v195_v27  ;;  %v92_v34 = vor.u32 8388608, %v91_v29  ;;  %v782_v28 = vld [vmem:[%s1681_s8 + $0x18] sm:$0xff] }
  0x28   :  { %800 = vperm.xlu1 %1306, %v782_v28   ;;  %897 = vperm.xlu0 %1305, %v1239_v42  }
  0x29   :  { %v198_v32 = vadd.s32 1, %v1215_v30  ;;  %v94_v35 = vadd.s32 1, %v1211_v31  ;;  %v1476_v44 = vshll.u32 %v196_v33, 8  ;;  %v1480_v46 = vshll.u32 %v92_v34, 8 }
  0x2b   :  { %vm199_vm1 = vcmp.gt.s32.totalorder %v198_v32, 0  ;;  %vm95_vm2 = vcmp.gt.s32.totalorder %v94_v35, 0 }
  0x2c   :  { %v200_v38 = vsel %vm199_vm1, %v198_v32, 0  ;;  %v96_v41 = vsel %vm95_vm2, %v94_v35, 0  ;;  %vm189_vm1 = vcmp.le.f32.partialorder %v188_v22, 0.7853982  ;;  %vm86_vm2 = vcmp.lt.s32.totalorder %v1452_v21, 0 }
  0x2d   :  { %v201_v39 = vshrl.u32 %v200_v38, 5  ;;  %v202_v40 = vand.u32 31, %v200_v38  ;;  %v1478_v45 = vand.u32 31, %v96_v41  ;;  %v1482_v58 = vshrl.u32 %v96_v41, 5 }
  0x2f   :  { %v203_v47 = vsub.s32 32, %v202_v40  ;;  %v205_v49 = vshll.u32 %v1343_v48, %v202_v40  ;;  %v208_v51 = vshll.u32 %v1344_v50, %v202_v40  ;;  %v211_v53 = vshll.u32 %v1345_v52, %v202_v40 }
  0x30   :  { %v214_v55 = vshll.u32 %v1346_v54, %v202_v40  ;;  %v217_v57 = vshll.u32 %v1347_v56, %v202_v40  ;;  %vm220_vm3 = vcmp.lt.s32.totalorder %v201_v39, 1  ;;  %vm221_vm4 = vcmp.lt.s32.totalorder %v201_v39, 2 }
  0x31   :  { %v204_v59 = vshrl.u32 %v1343_v48, %v203_v47  ;;  %v206_v60 = vshrl.u32 %v1344_v50, %v203_v47  ;;  %v209_v61 = vshrl.u32 %v1345_v52, %v203_v47  ;;  %v212_v62 = vshrl.u32 %v1346_v54, %v203_v47 }
  0x32   :  { %v215_v0 = vshrl.u32 %v1347_v56, %v203_v47  ;;  %v218_v3 = vshrl.u32 %v1348_v1, %v203_v47  ;;  %vm223_vm5 = vcmp.lt.s32.totalorder %v201_v39, 4  ;;  %v99_v10 = vsub.s32 32, %v1478_v45 }
  0x33   :  { %v207_v7 = vor.u32 %v206_v60, %v205_v49  ;;  %v210_v8 = vor.u32 %v209_v61, %v208_v51  ;;  %v213_v9 = vor.u32 %v212_v62, %v211_v53  ;;  %vm222_vm6 = vcmp.lt.s32.totalorder %v201_v39, 3  ;;  %v1240_v49 = vld [vmem:[%s1681_s8 + $0x28] sm:$0xff]  ;;  %v1242_v61 = vld [vmem:[%s1681_s8 + $0x38] sm:$0xff] }
  0x34   :  { %v216_v11 = vor.u32 %v215_v0, %v214_v55  ;;  %v219_v12 = vor.u32 %v218_v3, %v217_v57  ;;  %v101_v13 = vshll.u32 %v1343_v48, %v1478_v45  ;;  %v104_v27 = vshll.u32 %v1344_v50, %v1478_v45  ;;  %902 = vperm.xlu1 %1306, %v1240_v49  }
  0x35   :  { %v224_v14 = vsel %vm220_vm3, %v204_v59, %v207_v7  ;;  %v225_v15 = vsel %vm223_vm5, %v213_v9, 2102212464  ;;  %v228_v16 = vsel %vm220_vm3, %v207_v7, %v210_v8  ;;  %v232_v17 = vsel %vm220_vm3, %v210_v8, %v213_v9 }
  0x36   :  { %v226_v23 = vsel %vm222_vm6, %v210_v8, %v225_v15  ;;  %v229_v25 = vsel %vm223_vm5, %v216_v11, 920167782  ;;  %v233_v26 = vsel %vm223_vm5, %v219_v12, 1326507024  ;;  %v100_v31 = vshrl.u32 %v1343_v48, %v99_v10  ;;  %v997_v12 = vld [vmem:[#allocation3] sm:$0x1] }
  0x37   :  { %v230_v29 = vsel %vm222_vm6, %v213_v9, %v229_v25  ;;  %v234_v30 = vsel %vm222_vm6, %v216_v11, %v233_v26  ;;  %v102_v32 = vshrl.u32 %v1344_v50, %v99_v10  ;;  %v227_v33 = vsel %vm221_vm4, %v224_v14, %v226_v23 }
  0x38   :  { %v231_v34 = vsel %vm221_vm4, %v228_v16, %v230_v29  ;;  %v235_v35 = vsel %vm221_vm4, %v232_v17, %v234_v30  ;;  %v105_v36 = vshrl.u32 %v1345_v52, %v99_v10  ;;  %v107_v39 = vshll.u32 %v1345_v52, %v1478_v45  ;;  %912 = vperm.xlu1 %1306, %v1242_v61  }
  0x39   :  { %v1509_v37 = vmul.u32.u64.low %v1476_v44, %v235_v35  ;;  %v1510_v38 = vmul.u32.u64.high %v1476_v44, %v235_v35, %v1509_v37  ;;  %v1513_v40 = vmul.u32.u64.low %v1476_v44, %v231_v34  ;;  %v1514_v41 = vmul.u32.u64.high %v1476_v44, %v231_v34, %v1513_v40 }
  0x3a   :  { %v103_v43 = vor.u32 %v102_v32, %v101_v13  ;;  %v106_v47 = vor.u32 %v105_v36, %v104_v27  ;;  %v108_v48 = vshrl.u32 %v1346_v54, %v99_v10  ;;  %v110_v50 = vshll.u32 %v1346_v54, %v1478_v45 }
  0x3b   :  { %v111_v51 = vshrl.u32 %v1347_v56, %v99_v10  ;;  %v113_v53 = vshll.u32 %v1347_v56, %v1478_v45  ;;  %v114_v55 = vshrl.u32 %v1348_v1, %v99_v10  ;;  %v243_v57 = vmul.u32 %v1476_v44, %v227_v33  ;;  %v1241_v45 = vld [vmem:[%s1681_s8 + $0x30] sm:$0xff]  ;;  %s1271_s8 = sld [smem:[#allocation4 + $0xc]] }
  0x3c   :  { %v109_v59 = vor.u32 %v108_v48, %v107_v39  ;;  %vm116_vm7 = vcmp.lt.s32.totalorder %v1482_v58, 1  ;;  %vm117_vm8 = vcmp.lt.s32.totalorder %v1482_v58, 2  ;;  %vm245_vm9 = vc.u32 %v1510_v38, %v1513_v40  ;;  %907 = vperm.xlu0 %1305, %v1241_v45  }
  0x3d   :  { %v246_v52 = vadd.s32 1, %v1514_v41  ;;  %v112_v60 = vor.u32 %v111_v51, %v110_v50  ;;  %vm118_vm10 = vcmp.lt.s32.totalorder %v1482_v58, 3  ;;  %v115_v44 = vor.u32 %v114_v55, %v113_v53 }
  0x3e   :  { %vm119_vm11 = vcmp.lt.s32.totalorder %v1482_v58, 4  ;;  %v120_v54 = vsel %vm116_vm7, %v100_v31, %v103_v43  ;;  %v124_v56 = vsel %vm116_vm7, %v103_v43, %v106_v47  ;;  %v128_v1 = vsel %vm116_vm7, %v106_v47, %v109_v59 }
  0x3f   :  { %v247_v62 = vsel %vm245_vm9, %v246_v52, %v1514_v41  ;;  %v121_v63 = vsel %vm119_vm11, %v109_v59, 2102212464  ;;  %v125_v0 = vsel %vm119_vm11, %v112_v60, 920167782  ;;  %v129_v8 = vsel %vm119_vm11, %v115_v44, 1326507024 }
  0x40   :  { %v248_v3 = vadd.s32 %v247_v62, %v243_v57  ;;  %v122_v5 = vsel %vm118_vm10, %v106_v47, %v121_v63  ;;  %v126_v7 = vsel %vm118_vm10, %v109_v59, %v125_v0  ;;  %v130_v11 = vsel %vm118_vm10, %v112_v60, %v129_v8  ;;  %1000 = vperm.xlu0 %1305, %v997_v12  }
  0x41   :  { %v123_v9 = vsel %vm117_vm8, %v120_v54, %v122_v5  ;;  %v127_v10 = vsel %vm117_vm8, %v124_v56, %v126_v7  ;;  %v131_v14 = vsel %vm117_vm8, %v128_v1, %v130_v11  ;;  %vm85_vm3 = vcmp.le.f32.partialorder %v84_v24, 0.7853982 }
  0x42   :  { %v249_v13 = vadd.s32 536870912, %v248_v3  ;;  %v1560_v15 = vmul.u32.u64.low %v1480_v46, %v127_v10  ;;  %v1561_v16 = vmul.u32.u64.high %v1480_v46, %v127_v10, %v1560_v15  ;;  %v139_v25 = vmul.u32 %v1480_v46, %v123_v9 }
  0x43   :  { %v1564_v17 = vmul.u32.u64.low %v1480_v46, %v131_v14  ;;  %v1565_v18 = vmul.u32.u64.high %v1480_v46, %v131_v14, %v1564_v17  ;;  %v244_v46 = vadd.s32 %v1513_v40, %v1510_v38  ;;  %vm280_vm10 = vweird.f32 %v1450_v20 }
  0x44   :  { %v250_v23 = vshrl.u32 %v249_v13, 30  ;;  %v142_v27 = vadd.s32 1, %v1561_v16 }
  0x45   :  { %vm141_vm12 = vc.u32 %v1565_v18, %v1560_v15  ;;  %v140_v60 = vadd.s32 %v1560_v15, %v1565_v18 }
  0x46   :  { %v251_v26 = vshll.u32 %v250_v23, 30  ;;  %v143_v58 = vsel %vm141_vm12, %v142_v27, %v1561_v16  ;;  %v274_v38 = vsub.s32 4, %v250_v23 }
  0x47   :  { %v144_v29 = vadd.s32 %v143_v58, %v139_v25 }
  0x48   :  { %v252_v28 = vsub.s32 %v248_v3, %v251_v26  ;;  %v275_v1 = vsel %vm190_vm15, %v274_v38, %v250_v23 }
  0x49   :  { %v145_v31 = vadd.s32 536870912, %v144_v29  ;;  %v277_v9 = vsel %vm189_vm1, 0, %v275_v1 }
  0x4a   :  { %v254_v30 = vsub.s32 0, %v252_v28  ;;  %v281_v14 = vadd.s32 3, %v277_v9  ;;  %v488_v18 = vand.u32 3, %v277_v9 }
  0x4b   :  { %v146_v33 = vshrl.u32 %v145_v31, 30 }
  0x4c   :  { %v1216_v32 = vmin.u32 %v254_v30, %v252_v28  ;;  %v282_v17 = vand.u32 3, %v281_v14  ;;  %vm493_vm5 = vcmp.eq.s32.totalorder %v488_v18, 2  ;;  %vm490_vm7 = vcmp.eq.s32.totalorder %v488_v18, 0 }
  0x4d   :  { %v147_v35 = vshll.u32 %v146_v33, 30  ;;  %v170_v13 = vsub.s32 4, %v146_v33  ;;  %vm489_vm9 = vcmp.lt.s32.totalorder %v488_v18, 2 }
  0x4e   :  { %v256_v34 = vclz %v1216_v32  ;;  %vm287_vm4 = vcmp.eq.s32.totalorder %v282_v17, 2  ;;  %vm284_vm6 = vcmp.eq.s32.totalorder %v282_v17, 0  ;;  %vm283_vm8 = vcmp.lt.s32.totalorder %v282_v17, 2 }
  0x4f   :  { %v148_v37 = vsub.s32 %v144_v29, %v147_v35  ;;  %v171_v16 = vsel %vm86_vm2, %v170_v13, %v146_v33 }
  0x50   :  { %v1217_v36 = vadd.s32 4294967294, %v256_v34  ;;  %v173_v26 = vsel %vm85_vm3, 0, %v171_v16 }
  0x51   :  { %v150_v42 = vsub.s32 0, %v148_v37  ;;  %v177_v29 = vadd.s32 3, %v173_v26  ;;  %v385_v34 = vand.u32 3, %v173_v26 }
  0x52   :  { %vm1218_vm13 = vcmp.lt.s32.totalorder %v1217_v36, 0 }
  0x53   :  { %v259_v41 = vsel %vm1218_vm13, 0, %v1217_v36  ;;  %v1212_v48 = vmin.u32 %v150_v42, %v148_v37  ;;  %vm386_vm11 = vcmp.lt.s32.totalorder %v385_v34, 2  ;;  %vm390_vm13 = vcmp.eq.s32.totalorder %v385_v34, 2 }
  0x54   :  { %v260_v43 = vsub.s32 32, %v259_v41  ;;  %v261_v47 = vshll.u32 %v252_v28, %v259_v41  ;;  %v264_v39 = vsub.s32 4294967266, %v259_v41 }
  0x55   :  { %v152_v51 = vclz %v1212_v48 }
  0x56   :  { %v262_v49 = vshrl.u32 %v244_v46, %v260_v43  ;;  %v265_v50 = vadd.s32 127, %v264_v39 }
  0x57   :  { %v1213_v57 = vadd.s32 4294967294, %v152_v51 }
  0x58   :  { %v263_v53 = vor.u32 %v262_v49, %v261_v47  ;;  %v266_v55 = vshll.u32 %v265_v50, 23 }
  0x59   :  { %vm1214_vm14 = vcmp.lt.s32.totalorder %v1213_v57, 0 }
  0x5a   :  { %v267_v59 = vor.u32 4788187, %v266_v55  ;;  %v270_v52 = vcvt.s32.f32 %v263_v53  ;;  %v155_v40 = vsel %vm1214_vm14, 0, %v1213_v57 }
  0x5b   :  { %v156_v44 = vsub.s32 32, %v155_v40  ;;  %v157_v54 = vshll.u32 %v148_v37, %v155_v40  ;;  %v160_v56 = vsub.s32 4294967266, %v155_v40  ;;  %v178_v37 = vand.u32 3, %v177_v29 }
  0x5c   :  { %v268_v45 = vand.u32 2147483647, %v267_v59 }
  0x5d   :  { %v158_v62 = vshrl.u32 %v140_v60, %v156_v44  ;;  %v161_v63 = vadd.s32 127, %v160_v56  ;;  %vm183_vm12 = vcmp.eq.s32.totalorder %v178_v37, 2  ;;  %vm179_vm14 = vcmp.lt.s32.totalorder %v178_v37, 2 }
  0x5e   :  { %v271_v61 = vmul.f32 %v270_v52, %v268_v45 }
  0x5f   :  { %v159_v3 = vor.u32 %v158_v62, %v157_v54  ;;  %v162_v5 = vshll.u32 %v161_v63, 23 }
  0x60   :  { %v272_v0 = vxor.u32 2147483648, %v271_v61 }
  0x61   :  { %v163_v10 = vor.u32 4788187, %v162_v5  ;;  %v166_v11 = vcvt.s32.f32 %v159_v3 }
  0x62   :  { %v273_v7 = vsel %vm190_vm15, %v272_v0, %v271_v61  ;;  %vm180_vm15 = vcmp.eq.s32.totalorder %v178_v37, 0 }
  0x63   :  { %v276_v8 = vsel %vm189_vm1, %v1450_v20, %v273_v7  ;;  %v164_v12 = vand.u32 2147483647, %v163_v10  ;;  %vm387_vm1 = vcmp.eq.s32.totalorder %v385_v34, 0 }
  0x64   :  { %1314 = vcosq.f32 %v276_v8 }
  0x65   :  { %1316 = vsinq.f32 %v276_v8  ;;  %v167_v15 = vmul.f32 %v166_v11, %v164_v12 }
  0x67   :  { %v168_v22 = vxor.u32 2147483648, %v167_v15 }
  0x69   :  { %v169_v23 = vsel %vm86_vm2, %v168_v22, %v167_v15  ;;  %vm176_vm2 = vweird.f32 %v1452_v21 }
  0x6a   :  { %v172_v25 = vsel %vm85_vm3, %v1452_v21, %v169_v23  ;;  %vm703_vm3 = vcmask 392192  }
  0x6b   :  { %1318 = vcosq.f32 %v172_v25 }
  0x6c   :  { %1320 = vsinq.f32 %v172_v25 }
  0x6e   :  { %v1315_v27 = vpop.eup %1314 }
  0x6f   :  { %v1317_v28 = vpop.eup %1316  ;;  %v288_v58 = vxor.u32 2147483648, %v1315_v27 }
  0x70   :  { %v285_v24 = vxor.u32 2147483648, %v1317_v28 }
  0x71   :  { %v289_v30 = vsel %vm287_vm4, %v288_v58, %v1317_v28  ;;  %v495_v31 = vsel %vm493_vm5, %v288_v58, %v1317_v28  ;;  %vm813_vm4 = vcmask 261120  }
  0x72   :  { %v286_v32 = vsel %vm284_vm6, %v1315_v27, %v285_v24  ;;  %v492_v33 = vsel %vm490_vm7, %v1315_v27, %v285_v24 }
  0x73   :  { %v290_v35 = vsel %vm283_vm8, %v286_v32, %v289_v30  ;;  %v496_v36 = vsel %vm489_vm9, %v492_v33, %v495_v31 }
  0x74   :  { %v291_v46 = vsel %vm280_vm10, nan, %v290_v35  ;;  %v497_v41 = vsel %vm280_vm10, nan, %v496_v36 }
  0x75   :  { %v501_v42 = vrot.slane %v291_v46, 5  ;;  %v509_v43 = vrot.slane %v497_v41, 2  ;;  %v517_v47 = vmul.f32 2.0, %v291_v46  ;;  %v1319_v39 = vpop.eup %1318 }
  0x76   :  { %v1321_v20 = vpop.eup %1320  ;;  %v184_v50 = vxor.u32 2147483648, %v1319_v39 }
  0x77   :  { %505 = vst [vmem:[#allocation2 + $0x8] sm:$0x38] %v501_v42  ;;  %513 = vst [vmem:[#allocation2 + $0x18] ss:$-12 sps:$4 sm:$0xc1] %v509_v43   ;;  %v519_v48 = vmul.f32 %v517_v47, %v497_v41  ;;  %v521_v49 = vmul.f32 %v517_v47, %v291_v46  ;;  %v181_v57 = vxor.u32 2147483648, %v1321_v20 }
  0x78   :  { %v185_v59 = vsel %vm183_vm12, %v184_v50, %v1321_v20  ;;  %v392_v52 = vsel %vm390_vm13, %v184_v50, %v1321_v20 }
  0x79   :  { %v523_v51 = vsub.f32 1.0, %v521_v49  ;;  %v527_v53 = vrot.slane %v519_v48, 7  ;;  %v541_v55 = vmul.f32 2.0, %v519_v48  ;;  %v182_v38 = vsel %vm180_vm15, %v1319_v39, %v181_v57 }
  0x7a   :  { %v389_v40 = vsel %vm387_vm1, %v1319_v39, %v181_v57  ;;  %v186_v44 = vsel %vm179_vm14, %v182_v38, %v185_v59 }
  0x7b   :  { %531 = vst [vmem:[#allocation2 + $0x18] sm:$0xe] %v527_v53  ;;  %v535_v60 = vrot.slane %v523_v51, 4  ;;  %v543_v45 = vmul.f32 %v541_v55, %v523_v51  ;;  %v393_v54 = vsel %vm386_vm11, %v389_v40, %v392_v52  ;;  %v545_v56 = vmul.f32 %v541_v55, %v519_v48 }
  0x7c   :  { %v187_v62 = vsel %vm176_vm2, nan, %v186_v44  ;;  %v394_v63 = vsel %vm176_vm2, nan, %v393_v54 }
  0x7d   :  { %539 = vst [vmem:[#allocation2 + $0x18] sm:$0x70] %v535_v60  ;;  %v551_v61 = vrot.slane %v543_v45, 1  ;;  %v567_v0 = vmul.f32 2.0, %v543_v45  ;;  %v500_v1 = vrot.slane %v187_v62, 5  ;;  %v508_v3 = vrot.slane %v394_v63, 2 }
  0x7e   :  { %v516_v21 = vmul.f32 2.0, %v187_v62  ;;  %v547_v5 = vsub.f32 1.0, %v545_v56  ;;  %v648_v17 = vld [vmem:[#allocation2 + $0x8] sm:$0xff] }
  0x7f   :  { %555 = vst [vmem:[#allocation2 + $0x28] ss:$-12 sps:$4 sm:$0x83] %v551_v61   ;;  %v571_v7 = vmul.f32 %v567_v0, %v543_v45  ;;  %504 = vst [vmem:[#allocation2] sm:$0x38] %v500_v1 }
  0x80   :  { %512 = vst [vmem:[#allocation2 + $0x10] ss:$-12 sps:$4 sm:$0xc1] %v508_v3   ;;  %v518_v8 = vmul.f32 %v516_v21, %v394_v63  ;;  %v520_v9 = vmul.f32 %v516_v21, %v187_v62  ;;  %v561_v10 = vrot.slane %v547_v5, 6  ;;  %v569_v11 = vmul.f32 %v567_v0, %v547_v5  ;;  %v658_v0 = vld [vmem:[#allocation2 + $0x58] sm:$0xff] }
  0x81   :  { %v573_v12 = vsub.f32 1.0, %v571_v7  ;;  %v657_v7 = vld [vmem:[#allocation2 + $0x50] sm:$0xff] }
  0x82   :  { %v522_v13 = vsub.f32 1.0, %v520_v9  ;;  %v526_v14 = vrot.slane %v518_v8, 7  ;;  %v540_v15 = vmul.f32 2.0, %v518_v8  ;;  %565 = vst [vmem:[#allocation2 + $0x28] sm:$0x1c] %v561_v10  ;;  %v577_v22 = vrot.slane %v569_v11, 3 }
  0x83   :  { %583 = vst [vmem:[#allocation2 + $0x38] sm:$0x7] %v573_v12  ;;  %v585_v16 = vmul.f32 2.0, %v569_v11  ;;  %v1308_v10 = vld [vmem:[%s1678_s5] sm:$0xff]  }
  0x84   :  { %530 = vst [vmem:[#allocation2 + $0x10] sm:$0xe] %v526_v14  ;;  %v534_v18 = vrot.slane %v522_v13, 4  ;;  %v542_v23 = vmul.f32 %v540_v15, %v522_v13  ;;  %581 = vst [vmem:[#allocation2 + $0x28] sm:$0xe0] %v577_v22  ;;  %v544_v25 = vmul.f32 %v540_v15, %v518_v8 }
  0x85   :  { %v587_v26 = vmul.f32 %v585_v16, %v573_v12  ;;  %v589_v27 = vmul.f32 %v585_v16, %v569_v11  ;;  %v1309_v11 = vld [vmem:[%s1678_s5 + $0x8] sm:$0xff]   ;;  %s1283_s5 = sld [smem:[#allocation4 + $0x6]] }
  0x86   :  { %v650_v28 = vld [vmem:[#allocation2 + $0x18] sm:$0xff]  ;;  %538 = vst [vmem:[#allocation2 + $0x10] sm:$0x70] %v534_v18  ;;  %v550_v58 = vrot.slane %v542_v23, 1  ;;  %v546_v29 = vsub.f32 1.0, %v544_v25  ;;  %v566_v24 = vmul.f32 2.0, %v542_v23 }
  0x87   :  { %v660_v30 = vpack.c.bf16 %v650_v28, %v648_v17  ;;  %v591_v31 = vsub.f32 1.0, %v589_v27  ;;  %v595_v32 = vrot.slane %v587_v26, 5  ;;  %v611_v33 = vmul.f32 2.0, %v587_v26  ;;  %v647_v50 = vld [vmem:[#allocation2] sm:$0xff] }
  0x88   :  { %554 = vst [vmem:[#allocation2 + $0x20] ss:$-12 sps:$4 sm:$0x83] %v550_v58   ;;  %v560_v34 = vrot.slane %v546_v29, 6  ;;  %v568_v35 = vmul.f32 %v566_v24, %v546_v29  ;;  %v570_v36 = vmul.f32 %v566_v24, %v542_v23 }
  0x89   :  { %710 = vmatprep.subr.bf16.mxu0 %v660_v30  ;;  %599 = vst [vmem:[#allocation2 + $0x38] sm:$0x38] %v595_v32  ;;  %v603_v37 = vrot.slane %v591_v31, 2  ;;  %v613_v46 = vmul.f32 %v611_v33, %v591_v31  ;;  %v615_v41 = vmul.f32 %v611_v33, %v587_v26 }
  0x8a   :  { %564 = vst [vmem:[#allocation2 + $0x20] sm:$0x1c] %v560_v34  ;;  %v572_v42 = vsub.f32 1.0, %v570_v36  ;;  %v576_v43 = vrot.slane %v568_v35, 3  ;;  %v584_v47 = vmul.f32 2.0, %v568_v35 }
  0x8b   :  { %607 = vst [vmem:[#allocation2 + $0x48] ss:$-12 sps:$4 sm:$0xc1] %v603_v37   ;;  %v617_v39 = vsub.f32 1.0, %v615_v41  ;;  %v621_v48 = vrot.slane %v613_v46, 7  ;;  %v652_v60 = vld [vmem:[#allocation2 + $0x28] sm:$0xff] }
  0x8c   :  { %580 = vst [vmem:[#allocation2 + $0x20] sm:$0xe0] %v576_v43  ;;  %582 = vst [vmem:[#allocation2 + $0x30] sm:$0x7] %v572_v42  ;;  %v586_v49 = vmul.f32 %v584_v47, %v572_v42  ;;  %v588_v20 = vmul.f32 %v584_v47, %v568_v35 }
  0x8d   :  { %625 = vst [vmem:[#allocation2 + $0x48] sm:$0xe] %v621_v48  ;;  %v629_v51 = vrot.slane %v617_v39, 4 }
  0x8e   :  { %v590_v53 = vsub.f32 1.0, %v588_v20  ;;  %v594_v55 = vrot.slane %v586_v49, 5  ;;  %v610_v57 = vmul.f32 2.0, %v586_v49  ;;  %v1310_v20 = vld [vmem:[%s1680_s7] sm:$0xff]  }
  0x8f   :  { %v649_v59 = vld [vmem:[#allocation2 + $0x10] sm:$0xff]  ;;  %633 = vst [vmem:[#allocation2 + $0x48] sm:$0x70] %v629_v51 }
  0x90   :  { %v659_v52 = vpack.c.bf16 %v649_v59, %v647_v50  ;;  %598 = vst [vmem:[#allocation2 + $0x30] sm:$0x38] %v594_v55  ;;  %v602_v45 = vrot.slane %v590_v53, 2  ;;  %v612_v38 = vmul.f32 %v610_v57, %v590_v53  ;;  %v614_v40 = vmul.f32 %v610_v57, %v586_v49  ;;  %v1311_v50 = vld [vmem:[%s1680_s7 + $0x8] sm:$0xff]  }
  0x92   :  { %711 = vmatpush1.bf16.msra.mxu0 %v659_v52  ;;  %v654_v44 = vld [vmem:[#allocation2 + $0x38] sm:$0xff]  ;;  %606 = vst [vmem:[#allocation2 + $0x40] ss:$-12 sps:$4 sm:$0xc1] %v602_v45   ;;  %v616_v54 = vsub.f32 1.0, %v614_v40  ;;  %v620_v56 = vrot.slane %v612_v38, 7 }
  0x93   :  { %v662_v61 = vpack.c.bf16 %v654_v44, %v652_v60  ;;  %v651_v1 = vld [vmem:[#allocation2 + $0x20] sm:$0xff] }
  0x94   :  { %624 = vst [vmem:[#allocation2 + $0x40] sm:$0xe] %v620_v56  ;;  %v628_v62 = vrot.slane %v616_v54, 4 }
  0x95   :  { %712 = vmatprep.subr.bf16.mxu0 %v662_v61 }
  0x96   :  { %v656_v63 = vld [vmem:[#allocation2 + $0x48] sm:$0xff]  ;;  %632 = vst [vmem:[#allocation2 + $0x40] sm:$0x70] %v628_v62 }
  0x97   :  { %v664_v21 = vpack.c.bf16 %v658_v0, %v656_v63  ;;  %v676_v12 = vpop.permute.xlu0 %675  ;;  %v686_v25 = vpop.permute.xlu1 %685 }
  0x99   :  { %v653_v3 = vld [vmem:[#allocation2 + $0x30] sm:$0xff] }
  0x9a   :  { %v661_v5 = vpack.c.bf16 %v653_v3, %v651_v1 }
  0x9b   :  { %v681_v22 = vpop.permute.xlu0 %680  ;;  %v691_v34 = vpop.permute.xlu1 %690 }
  0x9c   :  { %713 = vmatpush1.bf16.msra.mxu0 %v661_v5 }
  0x9d   :  { %714 = vmatprep.subr.bf16.mxu0 %v664_v21  ;;  %v655_v8 = vld [vmem:[#allocation2 + $0x40] sm:$0xff] }
  0x9e   :  { %v663_v9 = vpack.c.bf16 %v657_v7, %v655_v8 }
  0x9f   :  { %v786_v51 = vpop.permute.xlu0 %785  ;;  %v791_v59 = vpop.permute.xlu1 %790 }
  0xa0   :  { %715 = vmatpush1.bf16.msra.mxu0 %v663_v9 }
  0xa3   :  { %1229 = vmatmul.mubr.msk.bf16.vlgmr.msra.gmra.mrb[0].mxu0 %vm703_vm3, %v1308_v10  ;;  %v796_v63 = vpop.permute.xlu0 %795 }
  0xa4   :  { %752 = vmatprep.mubr.bf16.mxu0 %v1342_v19 }
  0xa7   :  { %v801_v5 = vpop.permute.xlu1 %800 }
  0xab   :  { %1230 = vmatmul.mubr.msk.bf16.gmra.mrb[4].mxu0 %vm703_vm3, %v1309_v11 }
  0xac   :  { %1042 = vmatprep.mubr.bf16.mxu0 %v1342_v19 }
 0x176   :  { %v744_v13 = vpop.f32.mrb[0].mxu0 }
 0x177   :  { %v745_v14 = vadd.f32 %v744_v13, %v676_v12  ;;  %v746_v15 = vpop.f32.mrb[1].mxu0 }
 0x178   :  { %v747_v16 = vadd.f32 %v746_v15, %v676_v12  ;;  %v748_v17 = vpop.f32.mrb[2].mxu0 }
 0x179   :  { %v749_v18 = vadd.f32 %v748_v17, %v681_v22  ;;  %v750_v23 = vpop.f32.mrb[3].mxu0  ;;  %v763_v27 = vmax.f32 %v745_v14, 0.0  ;;  %v1312_v17 = vld [vmem:[%s1680_s7 + $0x10] sm:$0xff]  }
 0x17a   :  { %v751_v26 = vadd.f32 %v750_v23, %v681_v22  ;;  %v764_v58 = vmax.f32 %v747_v16, 0.0  ;;  %v898_v23 = vpop.permute.xlu0 %897 }
 0x17b   :  { %v765_v28 = vmax.f32 %v749_v18, 0.0  ;;  %v1313_v18 = vld [vmem:[%s1680_s7 + $0x18] sm:$0xff]  }
 0x17c   :  { %v766_v29 = vmax.f32 %v751_v26, 0.0 }
 0x17d   :  { %v771_v24 = vpack.c.bf16 %v765_v28, %v763_v27  ;;  %v903_v28 = vpop.permute.xlu1 %902 }
 0x17e   :  { %v754_v30 = vpop.f32.mrb[4].mxu0  ;;  %v772_v31 = vpack.c.bf16 %v766_v29, %v764_v58 }
 0x17f   :  { %v755_v32 = vadd.f32 %v754_v30, %v686_v25  ;;  %v756_v33 = vpop.f32.mrb[5].mxu0 }
 0x180   :  { %v757_v35 = vadd.f32 %v756_v33, %v686_v25  ;;  %v758_v36 = vpop.f32.mrb[6].mxu0  ;;  %820 = vmatprep.subr.bf16.mxu1 %v772_v31 }
 0x181   :  { %v759_v37 = vadd.f32 %v758_v36, %v691_v34  ;;  %v760_v46 = vpop.f32.mrb[7].mxu0  ;;  %821 = vmatpush1.bf16.msra.mxu1 %v771_v24  ;;  %v767_v42 = vmax.f32 %v755_v32, 0.0  ;;  %v908_v36 = vpop.permute.xlu0 %907 }
 0x182   :  { %v761_v41 = vadd.f32 %v760_v46, %v691_v34  ;;  %v768_v47 = vmax.f32 %v757_v35, 0.0 }
 0x183   :  { %v769_v43 = vmax.f32 %v759_v37, 0.0 }
 0x184   :  { %v770_v39 = vmax.f32 %v761_v41, 0.0 }
 0x185   :  { %v773_v48 = vpack.c.bf16 %v769_v43, %v767_v42  ;;  %v913_v43 = vpop.permute.xlu1 %912 }
 0x186   :  { %v774_v49 = vpack.c.bf16 %v770_v39, %v768_v47 }
 0x188   :  { %822 = vmatprep.subr.bf16.mxu1 %v774_v49 }
 0x189   :  { %823 = vmatpush1.bf16.msra.mxu1 %v773_v48 }
 0x18c   :  { %1233 = vmatmul.mubr.msk.bf16.vlgmr.msra.gmra.mrb[0].mxu1 %vm813_vm4, %v1310_v20 }
 0x18d   :  { %862 = vmatprep.mubr.bf16.mxu1 %v1342_v19 }
 0x194   :  { %1234 = vmatmul.mubr.msk.bf16.gmra.mrb[4].mxu1 %vm813_vm4, %v1311_v50 }
 0x195   :  { %963 = vmatprep.mubr.bf16.mxu1 %v1342_v19 }
 0x25f   :  { %v854_v53 = vpop.f32.mrb[0].mxu1 }
 0x260   :  { %v855_v55 = vadd.f32 %v854_v53, %v786_v51  ;;  %v856_v57 = vpop.f32.mrb[1].mxu1 }
 0x261   :  { %v857_v52 = vadd.f32 %v856_v57, %v786_v51  ;;  %v858_v60 = vpop.f32.mrb[2].mxu1 }
 0x262   :  { %v859_v45 = vadd.f32 %v858_v60, %v791_v59  ;;  %v860_v38 = vpop.f32.mrb[3].mxu1  ;;  %v873_v44 = vmax.f32 %v855_v55, 0.0  ;;  %v1052_v60 = vld [vmem:[%s1677_s4] ss:$8 sm:$0x3] }
 0x263   :  { %v861_v40 = vadd.f32 %v860_v38, %v791_v59  ;;  %v874_v56 = vmax.f32 %v857_v52, 0.0  ;;  %v996_v52 = vld [vmem:[%s1682_s9] sm:$0x1]  ;;  %v1250_v38 = vld [vmem:[%s1677_s4 + $0x1] ss:$8 sm:$0x3] }
 0x264   :  { %v875_v54 = vmax.f32 %v859_v45, 0.0  ;;  %v1053_v45 = vstv %s1248_s24  ;;  %s1267_s24 = sld [smem:[#allocation4 + $0x5]] }
 0x265   :  { %v876_v61 = vmax.f32 %v861_v40, 0.0  ;;  %v1058_v40 = vstv %s1249_s25  ;;  %s1268_s25 = sld [smem:[#allocation4 + $0x3]] }
 0x266   :  { %v881_v62 = vpack.c.bf16 %v875_v54, %v873_v44  ;;  %v1054_v44 = vmul.f32 %v1053_v45, %v1052_v60  ;;  %v1059_v54 = vmul.f32 %v1250_v38, %v1058_v40 }
 0x267   :  { %v882_v0 = vpack.c.bf16 %v876_v61, %v874_v56  ;;  %v864_v1 = vpop.f32.mrb[4].mxu1  ;;  %v1252_v56 = vld [vmem:[%s1677_s4 + $0x2] ss:$8 sm:$0x3]  ;;  %v1064_v61 = vstv %s1251_s0  ;;  %s1645_s0 = sld [smem:[#allocation4 + $0xa]] }
 0x268   :  { %v865_v3 = vadd.f32 %v864_v1, %v796_v63  ;;  %v866_v21 = vpop.f32.mrb[5].mxu1  ;;  %v1070_v1 = vstv %s1253_s26  ;;  %s1647_s26 = sld [smem:[#allocation4 + $0xb]] }
 0x269   :  { %v867_v7 = vadd.f32 %v866_v21, %v796_v63  ;;  %v868_v8 = vpop.f32.mrb[6].mxu1  ;;  %931 = vmatprep.subr.bf16.mxu1 %v882_v0  ;;  %v1065_v63 = vmul.f32 %v1252_v56, %v1064_v61  ;;  %v1254_v0 = vld [vmem:[%s1677_s4 + $0x3] ss:$8 sm:$0x3]  ;;  %v1171_v56 = vstv %s1278_s28 }
 0x26a   :  { %v869_v9 = vadd.f32 %v868_v8, %v801_v5  ;;  %v870_v10 = vpop.f32.mrb[7].mxu1  ;;  %932 = vmatpush1.bf16.msra.mxu1 %v881_v62  ;;  %v877_v12 = vmax.f32 %v865_v3, 0.0  ;;  %v1060_v62 = vadd.f32 %v1059_v54, %v1054_v44  ;;  %v1071_v21 = vmul.f32 %v1254_v0, %v1070_v1 }
 0x26b   :  { %v871_v11 = vadd.f32 %v870_v10, %v801_v5  ;;  %v878_v14 = vmax.f32 %v867_v7, 0.0  ;;  %v1256_v5 = vld [vmem:[%s1677_s4 + $0x4] ss:$8 sm:$0x3]  ;;  %v1076_v7 = vstv %s1255_s13  ;;  %v1137_v45 = vstv %s1268_s25 }
 0x26c   :  { %v879_v13 = vmax.f32 %v869_v9, 0.0  ;;  %v1066_v3 = vadd.f32 %v1065_v63, %v1060_v62  ;;  %v1077_v9 = vmul.f32 %v1256_v5, %v1076_v7  ;;  %v1258_v10 = vld [vmem:[%s1677_s4 + $0x5] ss:$8 sm:$0x3]  ;;  %v1168_v54 = vstv %s1277_s27 }
 0x26d   :  { %v880_v15 = vmax.f32 %v871_v11, 0.0  ;;  %v1082_v11 = vstv %s1257_s16  ;;  %s1280_s16 = sld [smem:[#allocation4 + $0x15]]  ;;  %v1140_v61 = vstv %s1645_s0  ;;  %v1154_v63 = vstv %s1273_s29 }
 0x26e   :  { %v883_v22 = vpack.c.bf16 %v879_v13, %v877_v12  ;;  %v1072_v8 = vadd.f32 %v1071_v21, %v1066_v3  ;;  %v1083_v13 = vmul.f32 %v1258_v10, %v1082_v11  ;;  %v1143_v62 = vstv %s1647_s26 }
 0x26f   :  { %v884_v16 = vpack.c.bf16 %v880_v15, %v878_v14  ;;  %v1260_v14 = vld [vmem:[%s1677_s4 + $0x6] ss:$8 sm:$0x3]  ;;  %v1088_v15 = vstv %s1259_s3  ;;  %v1157_v0 = vstv %s1274_s30  ;;  %v1175_v1 = vstv %s1279_s15  ;;  %s1276_s3 = sld [smem:[#allocation4 + $0x11]] }
 0x270   :  { %v1078_v12 = vadd.f32 %v1077_v9, %v1072_v8 }
 0x271   :  { %933 = vmatprep.subr.bf16.mxu1 %v884_v16  ;;  %v1089_v16 = vmul.f32 %v1260_v14, %v1088_v15  ;;  %v1161_v14 = vstv %s1275_s2 }
 0x272   :  { %934 = vmatpush1.bf16.msra.mxu1 %v883_v22  ;;  %v1084_v22 = vadd.f32 %v1083_v13, %v1078_v12  ;;  %v1147_v13 = vstv %s1271_s8 }
 0x273   :  { %v1179_v12 = vstv %s1280_s16 }
 0x275   :  { %1245 = vmatmul.mubr.msk.bf16.vlgmr.msra.gmra.mrb[8].mxu1 %vm813_vm4, %v1312_v17  ;;  %v1004_v17 = vshrl.u32 %v64_v2, 7 }
 0x276   :  { %973 = vmatprep.mubr.bf16.mxu1 %v1342_v19 }
 0x27d   :  { %1246 = vmatmul.mubr.msk.bf16.gmra.mrb[12].mxu1 %vm813_vm4, %v1313_v18  ;;  %v1262_v18 = vld [vmem:[%s1677_s4 + $0x7] ss:$8 sm:$0x3] }
 0x348   :  { %v965_v25 = vpop.f32.mrb[8].mxu1 }
 0x349   :  { %v966_v26 = vadd.f32 %v965_v25, %v898_v23  ;;  %v967_v27 = vpop.f32.mrb[9].mxu1  ;;  %v1090_v25 = vadd.f32 %v1089_v16, %v1084_v22 }
 0x34a   :  { %v968_v58 = vadd.f32 %v967_v27, %v898_v23  ;;  %v969_v29 = vpop.f32.mrb[10].mxu1  ;;  %v1094_v23 = vstv %s1261_s18  ;;  %v1349_v27 = vmov 1966171168  }
 0x34b   :  { %v970_v24 = vadd.f32 %v969_v29, %v903_v28  ;;  %v971_v30 = vpop.f32.mrb[11].mxu1  ;;  %v984_v32 = vmax.f32 %v966_v26, 0.0  ;;  %v1095_v26 = vmul.f32 %v1262_v18, %v1094_v23  ;;  %v1264_v29 = vld [vmem:[%s1677_s4 + $0x10] ss:$8 sm:$0x3]  ;;  %s1266_s4 = sld [smem:[#allocation4 + $0x2]] }
 0x34c   :  { %v972_v31 = vadd.f32 %v971_v30, %v903_v28  ;;  %v985_v34 = vmax.f32 %v968_v58, 0.0  ;;  %v1108_v28 = vunpack.c.l.s4 %v1349_v27  ;;  %v1005_v58 = vsub.s32 0, %v1004_v17  ;;  %v1001_v30 = vpop.permute.xlu0 %1000 }
 0x34d   :  { %v986_v33 = vmax.f32 %v970_v24, 0.0  ;;  %v1100_v24 = vstv %s1263_s21  ;;  %s1284_s21 = sld [smem:[#allocation4 + $0x8]] }
 0x34e   :  { %v987_v19 = vmax.f32 %v972_v31, 0.0  ;;  %v1096_v31 = vadd.f32 %v1095_v26, %v1090_v25  ;;  %v1006_v2 = vrot.slane %v1001_v30, %v1005_v58  ;;  %v1192_v30 = vstv %s1283_s5 }
 0x34f   :  { %v992_v35 = vpack.c.bf16 %v986_v33, %v984_v32  ;;  %v1101_v32 = vmul.f32 %v1264_v29, %v1100_v24  ;;  %v1109_v33 = vunpack.c.0.s8 %v1108_v28  ;;  %v1165_v28 = vstv %s1276_s3 }
 0x350   :  { %v993_v37 = vpack.c.bf16 %v987_v19, %v985_v34  ;;  %v975_v46 = vpop.f32.mrb[12].mxu1  ;;  %v1184_v24 = vstv %s1281_s17 }
 0x351   :  { %v976_v41 = vadd.f32 %v975_v46, %v908_v36  ;;  %v977_v42 = vpop.f32.mrb[13].mxu1  ;;  %v1112_v46 = vsub.s32 %v1109_v33, %v1004_v17  ;;  %v1130_v60 = vstv %s1266_s4 }
 0x352   :  { %v978_v47 = vadd.f32 %v977_v42, %v908_v36  ;;  %v979_v39 = vpop.f32.mrb[14].mxu1  ;;  %1010 = vmatprep.subr.bf16.mxu0 %v993_v37  ;;  %v1102_v37 = vadd.f32 %v1101_v32, %v1096_v31 }
 0x353   :  { %v980_v48 = vadd.f32 %v979_v39, %v913_v43  ;;  %v981_v49 = vpop.f32.mrb[15].mxu1  ;;  %1011 = vmatpush1.bf16.msra.mxu0 %v992_v35  ;;  %v988_v50 = vmax.f32 %v976_v41, 0.0 }
 0x354   :  { %v982_v20 = vadd.f32 %v981_v49, %v913_v43  ;;  %v989_v53 = vmax.f32 %v978_v47, 0.0  ;;  %v1103_v47 = vmax.f32 %v1102_v37, 0.0  ;;  %v1126_v49 = vstv %s1265_s10 }
 0x355   :  { %v990_v51 = vmax.f32 %v980_v48, 0.0 }
 0x356   :  { %v991_v55 = vmax.f32 %v982_v20, 0.0  ;;  %v1133_v20 = vstv %s1267_s24 }
 0x357   :  { %v994_v57 = vpack.c.bf16 %v990_v51, %v988_v50 }
 0x358   :  { %v995_v59 = vpack.c.bf16 %v991_v55, %v989_v53  ;;  %v1324_v53 = vld [vmem:[%s1674_s1 + $0x1] ss:$4 sm:$0x3] }
 0x359   :  { %v1127_v55 = vsub.f32 %v1324_v53, %v1126_v49 }
 0x35a   :  { %1012 = vmatprep.subr.bf16.mxu0 %v995_v59 }
 0x35b   :  { %1013 = vmatpush1.bf16.msra.mxu0 %v994_v57  ;;  %v1325_v57 = vld [vmem:[%s1674_s1] ss:$4 sm:$0x3]  ;;  %s1272_s1 = sld [smem:[#allocation4 + $0xd]] }
 0x35c   :  { %v1134_v59 = vsub.f32 %v1325_v57, %v1133_v20 }
 0x35e   :  { %1247 = vmatmul.mubr.msk.bf16.vlgmr.msra.gmra.mrb[8].mxu0 %vm813_vm4, %v996_v52 }
 0x361   :  { %v1151_v27 = vstv %s1272_s1 }
 0x431   :  { %v1044_v34 = vpop.f32.mrb[8].mxu0 }
 0x432   :  { %v1045_v19 = vadd.f32 %v1044_v34, %v1006_v2  ;;  %v1046_v35 = vpop.f32.mrb[9].mxu0  ;;  %v1196_v34 = vstv %s1284_s21 }
 0x433   :  { %v1047_v36 = vadd.f32 %v1046_v35, %v1006_v2  ;;  %v1048_v41 = vpop.f32.mrb[10].mxu0  ;;  %v1188_v2 = vstv %s1282_s20 }
 0x434   :  { %v1049_v42 = vpop.f32.mrb[11].mxu0 }
 0x435   :  { %v1106_v43 = vcombine.low %v1045_v19, %v1047_v36 }
 0x437   :  { %v1113_v39 = vrot.slane %v1106_v43, %v1112_v46 }
 0x439   :  { %v1120_v48 = vrot.slane %v1113_v39, %v1112_v46 }
 0x43b   :  { %v1122_v50 = vmul.f32 %v1120_v48, %v1103_v47 }
 0x43d   :  { %v1123_v51 = vadd.f32 %v1425_v4, %v1122_v50 }
 0x43f   :  { %v1124_v52 = vmax.f32 %v1123_v51, 0.05 }
 0x441   :  { %v1128_v38 = vmul.f32 %v1127_v55, %v1124_v52  ;;  %v1135_v40 = vmul.f32 %v1134_v59, %v1124_v52  ;;  %v1176_v11 = vmul.f32 %v1175_v1, %v1124_v52  ;;  %v1148_v18 = vmul.f32 %v1147_v13, %v1124_v52 }
 0x442   :  { %v1162_v23 = vmul.f32 %v1161_v14, %v1124_v52 }
 0x443   :  { %v1131_v4 = vmul.f32 %v1130_v60, %v1128_v38  ;;  %v1138_v44 = vmul.f32 %v1137_v45, %v1135_v40 }
 0x445   :  { %v1169_v3 = vmul.f32 %v1168_v54, %v1131_v4  ;;  %v1172_v21 = vmul.f32 %v1171_v56, %v1138_v44  ;;  %v1141_v5 = vmul.f32 %v1140_v61, %v1131_v4  ;;  %v1144_v7 = vmul.f32 %v1143_v62, %v1138_v44 }
 0x446   :  { %v1155_v8 = vmul.f32 %v1154_v63, %v1131_v4  ;;  %v1158_v9 = vmul.f32 %v1157_v0, %v1138_v44 }
 0x447   :  { %v1173_v10 = vadd.f32 %v1172_v21, %v1169_v3  ;;  %v1145_v22 = vadd.f32 %v1144_v7, %v1141_v5 }
 0x448   :  { %v1159_v16 = vadd.f32 %v1158_v9, %v1155_v8 }
 0x449   :  { %v1177_v15 = vadd.f32 %v1176_v11, %v1173_v10  ;;  %v1149_v25 = vadd.f32 %v1148_v18, %v1145_v22 }
 0x44a   :  { %v1163_v26 = vadd.f32 %v1162_v23, %v1159_v16 }
 0x44b   :  { %v1180_v17 = vadd.f32 %v1179_v12, %v1177_v15  ;;  %v1152_v58 = vadd.f32 %v1151_v27, %v1149_v25 }
 0x44c   :  { %v1166_v29 = vadd.f32 %v1165_v28, %v1163_v26 }
 0x44d   :  { %1322 = vrcp.f32 %v1180_v17  ;;  %1286 = vst.msk [vmem:[%s1684_s11 + $0x2] ss:$4 sm:$0x3] %vm1431_vm0, %v1180_v17  ;;  %v1193_v32 = vmul.f32 %v1192_v30, %v1152_v58 }
 0x44e   :  { %v1185_v31 = vmul.f32 %v1184_v24, %v1166_v29 }
 0x457   :  { %v1323_v33 = vpop.eup %1322 }
 0x458   :  { %v1186_v19 = vmul.f32 %v1323_v33, %v1185_v31  ;;  %v1194_v35 = vmul.f32 %v1323_v33, %v1193_v32 }
 0x45a   :  { %v1189_v36 = vadd.f32 %v1188_v2, %v1186_v19  ;;  %v1197_v37 = vadd.f32 %v1196_v34, %v1194_v35 }
 0x45c   :  { %1190 = vst.msk [vmem:[%s1684_s11] ss:$4 sm:$0x3] %vm1431_vm0, %v1189_v36  ;;  %1285 = vst.msk [vmem:[%s1684_s11 + $0x1] ss:$4 sm:$0x3] %vm1431_vm0, %v1197_v37 }
 0x45d   :  { %1206 = vsyncpa [#allocation5], 1 }

</bundles_post_ra>
